<compile_context>
chip_gen: v6e
topology: v6e:2x2x1
jax: 0.10.0
libtpu: 0.0.40
codegen_flags: <defaults>
</compile_context>

<pallas_src>
import jax
import jax.numpy as jnp
from jax.experimental import pallas as pl
from jax.experimental.pallas import tpu as pltpu


# ----------------------------- problem sizes -----------------------------
B = 2          # batch
T = 8          # listener time steps
V = 16         # num_labels
D = 32         # speller_hidden_dim == 2 * listener_hidden_dim (LAS constraint)
A = 32         # mlp_hidden_dim (attention)
L = 6          # label_maxlen (decode steps)
SOS = 0        # sos_index


# ------------------------------- kernel ----------------------------------
def speller_kernel(
    listener_ref,   # (B, T, D)
    w_gate_ref,     # (V+2D, 4D)  fused [token | context | hidden] -> gates (i,f,g,o)
    b_gate_ref,     # (1, 4D)     b_ih + b_hh
    phi_w_ref,      # (D, A)
    phi_b_ref,      # (1, A)
    psi_w_ref,      # (D, A)
    psi_b_ref,      # (1, A)
    fc_w_ref,       # (2D, V)     fused [decoder-state | context] -> logits
    fc_b_ref,       # (1, V)
    out_ref,        # (B, L*V)    lane-dense log-prob slab
):
    lf = listener_ref[...]                                     # (B, T, D)

    # comp_listener_feat = relu(psi(listener_feats)); computed once, kept in vregs.
    clf = jnp.maximum(
        jnp.dot(lf.reshape(B * T, D), psi_w_ref[...],
                preferred_element_type=jnp.float32) + psi_b_ref[...],
        0.0,
    ).reshape(B, T, A)                                          # (B, T, A)

    w_gate = w_gate_ref[...]
    b_gate = b_gate_ref[...]
    phi_w = phi_w_ref[...]
    phi_b = phi_b_ref[...]
    fc_w = fc_w_ref[...]
    fc_b = fc_b_ref[...]

    iota_v = jax.lax.broadcasted_iota(jnp.int32, (B, V), 1)

    # decode-loop state
    h = jnp.zeros((B, D), jnp.float32)
    c = jnp.zeros((B, D), jnp.float32)
    tok = jnp.where(iota_v == SOS, 1.0, 0.0).astype(jnp.float32)
    ctx = lf[:, 0, :]                                           # first rnn input uses feats[:, 0, :]

    outs = []
    for _step in range(L):   # fully unrolled: tiny trip count, static indices
        # ---------------- LSTM cell: one fused matmul for all four gates ----------------
        x = jnp.concatenate([tok, ctx, h], axis=-1)             # (B, V+2D) = (B, 80)
        gates = jnp.dot(x, w_gate,
                        preferred_element_type=jnp.float32) + b_gate   # (B, 4D) = (B, 128)
        sig = jax.nn.sigmoid(gates)                             # i, f, o read from here
        g_g = jnp.tanh(gates[:, 2 * D:3 * D])
        i_g = sig[:, 0:D]
        f_g = sig[:, D:2 * D]
        o_g = sig[:, 3 * D:4 * D]
        c = f_g * c + i_g * g_g
        h = o_g * jnp.tanh(c)

        # ---------------- Attention (AttentionLayer, multi_head=1) ----------------
        q = jnp.maximum(
            jnp.dot(h, phi_w, preferred_element_type=jnp.float32) + phi_b, 0.0
        ).reshape(B, 1, A)                                      # comp_decoder_state (B,1,A)
        energy = jnp.einsum('bsa,bta->bst', q, clf,
                            preferred_element_type=jnp.float32)  # (B, 1, T)
        energy = energy - jnp.max(energy, axis=-1, keepdims=True)
        e = jnp.exp(energy)
        attn = e * pl.reciprocal(jnp.sum(e, axis=-1, keepdims=True), approx=True)
        context = jnp.einsum('bst,btd->bsd', attn, lf,
                             preferred_element_type=jnp.float32).reshape(B, D)

        # ---------------- Output projection + log_softmax ----------------
        hc = jnp.concatenate([h, context], axis=-1)             # (B, 2D)
        logits = jnp.dot(hc, fc_w,
                         preferred_element_type=jnp.float32) + fc_b    # (B, V)
        m = jnp.max(logits, axis=-1, keepdims=True)
        lse = jnp.log(jnp.sum(jnp.exp(logits - m), axis=-1, keepdims=True)) + m
        log_probs = logits - lse
        outs.append(log_probs)

        # ---------------- Greedy feedback (ground_truth=None, sample_decode=False) ----
        idx = jnp.argmax(log_probs, axis=-1, keepdims=True)     # (B, 1)
        tok = jnp.where(iota_v == idx, 1.0, 0.0).astype(jnp.float32)
        ctx = context
        # TODO(synk): teacher-forcing / Categorical-sampling branches use host-side
        # python (.item(), np.random) and are not translated; greedy decode only.

    # single lane-dense writeback: (B, L*V)
    out_ref[...] = jnp.concatenate(outs, axis=-1)


# ------------------------------- wrapper ----------------------------------
_VMEM_SPEC = pl.BlockSpec(memory_space=pltpu.MemorySpace.VMEM)


@jax.jit
def speller_forward(listener_feats, params):
    (w_gate, b_gate, phi_w, phi_b, psi_w, psi_b, fc_w, fc_b) = params

    out_flat = pl.pallas_call(
        speller_kernel,
        out_shape=jax.ShapeDtypeStruct((B, L * V), jnp.float32),
        in_specs=[_VMEM_SPEC] * 9,
        out_specs=_VMEM_SPEC,
    )(listener_feats, w_gate, b_gate, phi_w, phi_b, psi_w, psi_b, fc_w, fc_b)

    # free reshape (contiguous), no transpose needed: (B, L*V) -> (B, L, V)
    return out_flat.reshape(B, L, V)


def init_params(key):
    """Deterministic synthetic init (PyTorch-like uniform), fused kernel-friendly layouts."""
    ks = jax.random.split(key, 10)

    def u(k, shape, fan_in):
        bound = 1.0 / jnp.sqrt(jnp.float32(fan_in))
        return jax.random.uniform(k, shape, jnp.float32, -bound, bound)

    # LSTM (gate order i,f,g,o), PyTorch bound 1/sqrt(hidden_size)=1/sqrt(D).
    # Fused gate weight rows: [token (V) | context (D) | hidden (D)] -> 4D columns.
    w_ih = u(ks[0], (V + D, 4 * D), D)     # input (token|context) part of weight_ih^T
    w_hh = u(ks[1], (D, 4 * D), D)         # weight_hh^T
    w_gate = jnp.concatenate([w_ih, w_hh], axis=0)          # (V+2D, 4D) = (80, 128)
    b_gate = u(ks[2], (1, 4 * D), D) + u(ks[3], (1, 4 * D), D)   # b_ih + b_hh

    # attention MLPs (phi, psi): Linear(D -> A)
    phi_w = u(ks[4], (D, A), D)
    phi_b = u(ks[5], (1, A), D)
    psi_w = u(ks[6], (D, A), D)
    psi_b = u(ks[7], (1, A), D)

    # fc_out: Linear(2D -> V), fused [decoder-state | context]
    fc_w = u(ks[8], (2 * D, V), 2 * D)
    fc_b = u(ks[9], (1, V), 2 * D)
    return (w_gate, b_gate, phi_w, phi_b, psi_w, psi_b, fc_w, fc_b)


if __name__ == "__main__":
    key = jax.random.PRNGKey(0)
    k_feat, k_par = jax.random.split(key)
    listener_feats = jax.random.normal(k_feat, (B, T, D), jnp.float32)
    params = init_params(k_par)

    log_probs_seq = speller_forward(listener_feats, params)
    jax.block_until_ready(log_probs_seq)

    assert log_probs_seq.shape == (B, L, V)
    # each row of log-probs should (approximately) exponentiate-sum to 1
    s = jnp.sum(jnp.exp(log_probs_seq), axis=-1)
    assert bool(jnp.all(jnp.abs(s - 1.0) < 1e-4))
    print("KERNEL_OK")
</pallas_src>

<mosaic_0001>
module attributes {stable_mosaic.version = 11 : i64} {
  func.func @speller_kernel(%arg0: memref<2x8x32xf32, #tpu.memory_space<vmem>>, %arg1: memref<80x128xf32, #tpu.memory_space<vmem>>, %arg2: memref<1x128xf32, #tpu.memory_space<vmem>>, %arg3: memref<32x32xf32, #tpu.memory_space<vmem>>, %arg4: memref<1x32xf32, #tpu.memory_space<vmem>>, %arg5: memref<32x32xf32, #tpu.memory_space<vmem>>, %arg6: memref<1x32xf32, #tpu.memory_space<vmem>>, %arg7: memref<64x16xf32, #tpu.memory_space<vmem>>, %arg8: memref<1x16xf32, #tpu.memory_space<vmem>>, %arg9: memref<2x96xf32, #tpu.memory_space<vmem>>) attributes {dimension_semantics = [], scalar_prefetch = 0 : i64, scratch_operands = 0 : i64, tpu.core_type = #tpu.core_type<tc>} {
    %c0 = arith.constant 0 : index
    %c0_0 = arith.constant 0 : index
    %c0_1 = arith.constant 0 : index
    %0 = vector.load %arg0[%c0, %c0_0, %c0_1] : memref<2x8x32xf32, #tpu.memory_space<vmem>>, vector<2x8x32xf32>
    %1 = vector.shape_cast %0 : vector<2x8x32xf32> to vector<16x32xf32>
    %c0_2 = arith.constant 0 : index
    %c0_3 = arith.constant 0 : index
    %2 = vector.load %arg5[%c0_2, %c0_3] : memref<32x32xf32, #tpu.memory_space<vmem>>, vector<32x32xf32>
    %cst = arith.constant dense<0.000000e+00> : vector<16x32xf32>
    %3 = tpu.matmul %1, %2, %cst {dimension_numbers = #tpu.dot_dimension_numbers<[1], [0], [0], [1], [0, 0, 1, 1], [], []>} : vector<16x32xf32>, vector<32x32xf32>, vector<16x32xf32> -> vector<16x32xf32>
    %c0_4 = arith.constant 0 : index
    %c0_5 = arith.constant 0 : index
    %4 = vector.load %arg6[%c0_4, %c0_5] : memref<1x32xf32, #tpu.memory_space<vmem>>, vector<1x32xf32>
    %5 = vector.broadcast %4 : vector<1x32xf32> to vector<16x32xf32>
    %6 = arith.addf %3, %5 : vector<16x32xf32>
    %cst_6 = arith.constant 0.000000e+00 : f32
    %7 = vector.broadcast %cst_6 : f32 to vector<16x32xf32>
    %8 = arith.maximumf %6, %7 : vector<16x32xf32>
    %9 = vector.shape_cast %8 : vector<16x32xf32> to vector<2x8x32xf32>
    %c0_7 = arith.constant 0 : index
    %c0_8 = arith.constant 0 : index
    %10 = vector.load %arg1[%c0_7, %c0_8] : memref<80x128xf32, #tpu.memory_space<vmem>>, vector<80x128xf32>
    %c0_9 = arith.constant 0 : index
    %c0_10 = arith.constant 0 : index
    %11 = vector.load %arg2[%c0_9, %c0_10] : memref<1x128xf32, #tpu.memory_space<vmem>>, vector<1x128xf32>
    %c0_11 = arith.constant 0 : index
    %c0_12 = arith.constant 0 : index
    %12 = vector.load %arg3[%c0_11, %c0_12] : memref<32x32xf32, #tpu.memory_space<vmem>>, vector<32x32xf32>
    %c0_13 = arith.constant 0 : index
    %c0_14 = arith.constant 0 : index
    %13 = vector.load %arg4[%c0_13, %c0_14] : memref<1x32xf32, #tpu.memory_space<vmem>>, vector<1x32xf32>
    %c0_15 = arith.constant 0 : index
    %c0_16 = arith.constant 0 : index
    %14 = vector.load %arg7[%c0_15, %c0_16] : memref<64x16xf32, #tpu.memory_space<vmem>>, vector<64x16xf32>
    %c0_17 = arith.constant 0 : index
    %c0_18 = arith.constant 0 : index
    %15 = vector.load %arg8[%c0_17, %c0_18] : memref<1x16xf32, #tpu.memory_space<vmem>>, vector<1x16xf32>
    %16 = tpu.iota {dimensions = array<i32: 1>} : vector<2x16xi32>
    %cst_19 = arith.constant 0.000000e+00 : f32
    %17 = vector.broadcast %cst_19 : f32 to vector<2x32xf32>
    %cst_20 = arith.constant 0.000000e+00 : f32
    %18 = vector.broadcast %cst_20 : f32 to vector<2x32xf32>
    %c0_i32 = arith.constant 0 : i32
    %19 = vector.broadcast %c0_i32 : i32 to vector<2x16xi32>
    %20 = arith.cmpi eq, %16, %19 : vector<2x16xi32>
    %cst_21 = arith.constant 1.000000e+00 : f32
    %cst_22 = arith.constant 0.000000e+00 : f32
    %21 = vector.broadcast %cst_21 : f32 to vector<2x16xf32>
    %22 = vector.broadcast %cst_22 : f32 to vector<2x16xf32>
    %23 = arith.select %20, %21, %22 : vector<2x16xi1>, vector<2x16xf32>
    %24 = vector.extract_strided_slice %0 {offsets = [0, 0, 0], sizes = [2, 1, 32], strides = [1, 1, 1]} : vector<2x8x32xf32> to vector<2x1x32xf32>
    %25 = vector.shape_cast %24 : vector<2x1x32xf32> to vector<2x32xf32>
    %26 = tpu.concatenate %23, %25, %17 in 1 : vector<2x16xf32>, vector<2x32xf32>, vector<2x32xf32> -> vector<2x80xf32>
    %cst_23 = arith.constant dense<0.000000e+00> : vector<2x128xf32>
    %27 = tpu.matmul %26, %10, %cst_23 {dimension_numbers = #tpu.dot_dimension_numbers<[1], [0], [0], [1], [0, 0, 1, 1], [], []>} : vector<2x80xf32>, vector<80x128xf32>, vector<2x128xf32> -> vector<2x128xf32>
    %28 = vector.broadcast %11 : vector<1x128xf32> to vector<2x128xf32>
    %29 = arith.addf %27, %28 : vector<2x128xf32>
    %30 = arith.negf %29 : vector<2x128xf32>
    %31 = math.exp %30 : vector<2x128xf32>
    %cst_24 = arith.constant 1.000000e+00 : f32
    %32 = vector.broadcast %cst_24 : f32 to vector<2x128xf32>
    %33 = arith.addf %32, %31 : vector<2x128xf32>
    %34 = arith.divf %32, %33 : vector<2x128xf32>
    %35 = vector.extract_strided_slice %29 {offsets = [0, 64], sizes = [2, 32], strides = [1, 1]} : vector<2x128xf32> to vector<2x32xf32>
    %36 = math.tanh %35 : vector<2x32xf32>
    %37 = vector.extract_strided_slice %34 {offsets = [0, 0], sizes = [2, 32], strides = [1, 1]} : vector<2x128xf32> to vector<2x32xf32>
    %38 = vector.extract_strided_slice %34 {offsets = [0, 32], sizes = [2, 32], strides = [1, 1]} : vector<2x128xf32> to vector<2x32xf32>
    %39 = vector.extract_strided_slice %34 {offsets = [0, 96], sizes = [2, 32], strides = [1, 1]} : vector<2x128xf32> to vector<2x32xf32>
    %40 = arith.mulf %38, %18 : vector<2x32xf32>
    %41 = arith.mulf %37, %36 : vector<2x32xf32>
    %42 = arith.addf %40, %41 : vector<2x32xf32>
    %43 = math.tanh %42 : vector<2x32xf32>
    %44 = arith.mulf %39, %43 : vector<2x32xf32>
    %cst_25 = arith.constant dense<0.000000e+00> : vector<2x32xf32>
    %45 = tpu.matmul %44, %12, %cst_25 {dimension_numbers = #tpu.dot_dimension_numbers<[1], [0], [0], [1], [0, 0, 1, 1], [], []>} : vector<2x32xf32>, vector<32x32xf32>, vector<2x32xf32> -> vector<2x32xf32>
    %46 = vector.broadcast %13 : vector<1x32xf32> to vector<2x32xf32>
    %47 = arith.addf %45, %46 : vector<2x32xf32>
    %cst_26 = arith.constant 0.000000e+00 : f32
    %48 = vector.broadcast %cst_26 : f32 to vector<2x32xf32>
    %49 = arith.maximumf %47, %48 : vector<2x32xf32>
    %50 = vector.shape_cast %49 : vector<2x32xf32> to vector<2x1x32xf32>
    "tpu.trace_start"() <{level = 10 : i32, message = "bsa,bta->bst"}> : () -> ()
    %cst_27 = arith.constant dense<0.000000e+00> : vector<2x1x8xf32>
    %51 = tpu.matmul %50, %9, %cst_27 {dimension_numbers = #tpu.dot_dimension_numbers<[2], [2], [1], [1], [0, 0, 0, 1, 1, 1], [0], [0]>} : vector<2x1x32xf32>, vector<2x8x32xf32>, vector<2x1x8xf32> -> vector<2x1x8xf32>
    "tpu.trace_stop"() : () -> ()
    %cst_28 = arith.constant dense<0xFF800000> : vector<2x1xf32>
    %52 = vector.multi_reduction <maximumf>, %51, %cst_28 [2] : vector<2x1x8xf32> to vector<2x1xf32>
    %53 = vector.shape_cast %52 : vector<2x1xf32> to vector<2x1x1xf32>
    %54 = vector.broadcast %53 : vector<2x1x1xf32> to vector<2x1x8xf32>
    %55 = arith.subf %51, %54 : vector<2x1x8xf32>
    %56 = math.exp %55 : vector<2x1x8xf32>
    %cst_29 = arith.constant dense<0.000000e+00> : vector<2x1xf32>
    %57 = vector.multi_reduction <add>, %56, %cst_29 [2] : vector<2x1x8xf32> to vector<2x1xf32>
    %58 = vector.shape_cast %57 : vector<2x1xf32> to vector<2x1x1xf32>
    %59 = tpu.reciprocal %58 {approx = true} : vector<2x1x1xf32> -> vector<2x1x1xf32>
    %60 = vector.broadcast %59 : vector<2x1x1xf32> to vector<2x1x8xf32>
    %61 = arith.mulf %56, %60 : vector<2x1x8xf32>
    "tpu.trace_start"() <{level = 10 : i32, message = "bst,btd->bsd"}> : () -> ()
    %cst_30 = arith.constant dense<0.000000e+00> : vector<2x1x32xf32>
    %62 = tpu.matmul %61, %0, %cst_30 {dimension_numbers = #tpu.dot_dimension_numbers<[2], [1], [1], [2], [0, 0, 0, 1, 1, 2], [0], [0]>} : vector<2x1x8xf32>, vector<2x8x32xf32>, vector<2x1x32xf32> -> vector<2x1x32xf32>
    "tpu.trace_stop"() : () -> ()
    %63 = vector.shape_cast %62 : vector<2x1x32xf32> to vector<2x32xf32>
    %64 = tpu.concatenate %44, %63 in 1 : vector<2x32xf32>, vector<2x32xf32> -> vector<2x64xf32>
    %cst_31 = arith.constant dense<0.000000e+00> : vector<2x16xf32>
    %65 = tpu.matmul %64, %14, %cst_31 {dimension_numbers = #tpu.dot_dimension_numbers<[1], [0], [0], [1], [0, 0, 1, 1], [], []>} : vector<2x64xf32>, vector<64x16xf32>, vector<2x16xf32> -> vector<2x16xf32>
    %66 = vector.broadcast %15 : vector<1x16xf32> to vector<2x16xf32>
    %67 = arith.addf %65, %66 : vector<2x16xf32>
    %cst_32 = arith.constant dense<0xFF800000> : vector<2xf32>
    %68 = vector.multi_reduction <maximumf>, %67, %cst_32 [1] : vector<2x16xf32> to vector<2xf32>
    %69 = vector.shape_cast %68 : vector<2xf32> to vector<2x1xf32>
    %70 = vector.broadcast %69 : vector<2x1xf32> to vector<2x16xf32>
    %71 = arith.subf %67, %70 : vector<2x16xf32>
    %72 = math.exp %71 : vector<2x16xf32>
    %cst_33 = arith.constant dense<0.000000e+00> : vector<2xf32>
    %73 = vector.multi_reduction <add>, %72, %cst_33 [1] : vector<2x16xf32> to vector<2xf32>
    %74 = vector.shape_cast %73 : vector<2xf32> to vector<2x1xf32>
    %75 = math.log %74 : vector<2x1xf32>
    %76 = arith.addf %75, %69 : vector<2x1xf32>
    %77 = vector.broadcast %76 : vector<2x1xf32> to vector<2x16xf32>
    %78 = arith.subf %67, %77 : vector<2x16xf32>
    %79 = tpu.reduce_index %78 {axis = 1 : i32, kind = #tpu.reduction_kind<arg_max>} : vector<2x16xf32> -> vector<2xi32>
    %80 = vector.shape_cast %79 : vector<2xi32> to vector<2x1xi32>
    %81 = vector.broadcast %80 : vector<2x1xi32> to vector<2x16xi32>
    %82 = arith.cmpi eq, %16, %81 : vector<2x16xi32>
    %cst_34 = arith.constant 1.000000e+00 : f32
    %cst_35 = arith.constant 0.000000e+00 : f32
    %83 = vector.broadcast %cst_34 : f32 to vector<2x16xf32>
    %84 = vector.broadcast %cst_35 : f32 to vector<2x16xf32>
    %85 = arith.select %82, %83, %84 : vector<2x16xi1>, vector<2x16xf32>
    %86 = tpu.concatenate %85, %63, %44 in 1 : vector<2x16xf32>, vector<2x32xf32>, vector<2x32xf32> -> vector<2x80xf32>
    %cst_36 = arith.constant dense<0.000000e+00> : vector<2x128xf32>
    %87 = tpu.matmul %86, %10, %cst_36 {dimension_numbers = #tpu.dot_dimension_numbers<[1], [0], [0], [1], [0, 0, 1, 1], [], []>} : vector<2x80xf32>, vector<80x128xf32>, vector<2x128xf32> -> vector<2x128xf32>
    %88 = vector.broadcast %11 : vector<1x128xf32> to vector<2x128xf32>
    %89 = arith.addf %87, %88 : vector<2x128xf32>
    %90 = arith.negf %89 : vector<2x128xf32>
    %91 = math.exp %90 : vector<2x128xf32>
    %cst_37 = arith.constant 1.000000e+00 : f32
    %92 = vector.broadcast %cst_37 : f32 to vector<2x128xf32>
    %93 = arith.addf %92, %91 : vector<2x128xf32>
    %94 = arith.divf %92, %93 : vector<2x128xf32>
    %95 = vector.extract_strided_slice %89 {offsets = [0, 64], sizes = [2, 32], strides = [1, 1]} : vector<2x128xf32> to vector<2x32xf32>
    %96 = math.tanh %95 : vector<2x32xf32>
    %97 = vector.extract_strided_slice %94 {offsets = [0, 0], sizes = [2, 32], strides = [1, 1]} : vector<2x128xf32> to vector<2x32xf32>
    %98 = vector.extract_strided_slice %94 {offsets = [0, 32], sizes = [2, 32], strides = [1, 1]} : vector<2x128xf32> to vector<2x32xf32>
    %99 = vector.extract_strided_slice %94 {offsets = [0, 96], sizes = [2, 32], strides = [1, 1]} : vector<2x128xf32> to vector<2x32xf32>
    %100 = arith.mulf %98, %42 : vector<2x32xf32>
    %101 = arith.mulf %97, %96 : vector<2x32xf32>
    %102 = arith.addf %100, %101 : vector<2x32xf32>
    %103 = math.tanh %102 : vector<2x32xf32>
    %104 = arith.mulf %99, %103 : vector<2x32xf32>
    %cst_38 = arith.constant dense<0.000000e+00> : vector<2x32xf32>
    %105 = tpu.matmul %104, %12, %cst_38 {dimension_numbers = #tpu.dot_dimension_numbers<[1], [0], [0], [1], [0, 0, 1, 1], [], []>} : vector<2x32xf32>, vector<32x32xf32>, vector<2x32xf32> -> vector<2x32xf32>
    %106 = vector.broadcast %13 : vector<1x32xf32> to vector<2x32xf32>
    %107 = arith.addf %105, %106 : vector<2x32xf32>
    %cst_39 = arith.constant 0.000000e+00 : f32
    %108 = vector.broadcast %cst_39 : f32 to vector<2x32xf32>
    %109 = arith.maximumf %107, %108 : vector<2x32xf32>
    %110 = vector.shape_cast %109 : vector<2x32xf32> to vector<2x1x32xf32>
    "tpu.trace_start"() <{level = 10 : i32, message = "bsa,bta->bst"}> : () -> ()
    %cst_40 = arith.constant dense<0.000000e+00> : vector<2x1x8xf32>
    %111 = tpu.matmul %110, %9, %cst_40 {dimension_numbers = #tpu.dot_dimension_numbers<[2], [2], [1], [1], [0, 0, 0, 1, 1, 1], [0], [0]>} : vector<2x1x32xf32>, vector<2x8x32xf32>, vector<2x1x8xf32> -> vector<2x1x8xf32>
    "tpu.trace_stop"() : () -> ()
    %cst_41 = arith.constant dense<0xFF800000> : vector<2x1xf32>
    %112 = vector.multi_reduction <maximumf>, %111, %cst_41 [2] : vector<2x1x8xf32> to vector<2x1xf32>
    %113 = vector.shape_cast %112 : vector<2x1xf32> to vector<2x1x1xf32>
    %114 = vector.broadcast %113 : vector<2x1x1xf32> to vector<2x1x8xf32>
    %115 = arith.subf %111, %114 : vector<2x1x8xf32>
    %116 = math.exp %115 : vector<2x1x8xf32>
    %cst_42 = arith.constant dense<0.000000e+00> : vector<2x1xf32>
    %117 = vector.multi_reduction <add>, %116, %cst_42 [2] : vector<2x1x8xf32> to vector<2x1xf32>
    %118 = vector.shape_cast %117 : vector<2x1xf32> to vector<2x1x1xf32>
    %119 = tpu.reciprocal %118 {approx = true} : vector<2x1x1xf32> -> vector<2x1x1xf32>
    %120 = vector.broadcast %119 : vector<2x1x1xf32> to vector<2x1x8xf32>
    %121 = arith.mulf %116, %120 : vector<2x1x8xf32>
    "tpu.trace_start"() <{level = 10 : i32, message = "bst,btd->bsd"}> : () -> ()
    %cst_43 = arith.constant dense<0.000000e+00> : vector<2x1x32xf32>
    %122 = tpu.matmul %121, %0, %cst_43 {dimension_numbers = #tpu.dot_dimension_numbers<[2], [1], [1], [2], [0, 0, 0, 1, 1, 2], [0], [0]>} : vector<2x1x8xf32>, vector<2x8x32xf32>, vector<2x1x32xf32> -> vector<2x1x32xf32>
    "tpu.trace_stop"() : () -> ()
    %123 = vector.shape_cast %122 : vector<2x1x32xf32> to vector<2x32xf32>
    %124 = tpu.concatenate %104, %123 in 1 : vector<2x32xf32>, vector<2x32xf32> -> vector<2x64xf32>
    %cst_44 = arith.constant dense<0.000000e+00> : vector<2x16xf32>
    %125 = tpu.matmul %124, %14, %cst_44 {dimension_numbers = #tpu.dot_dimension_numbers<[1], [0], [0], [1], [0, 0, 1, 1], [], []>} : vector<2x64xf32>, vector<64x16xf32>, vector<2x16xf32> -> vector<2x16xf32>
    %126 = vector.broadcast %15 : vector<1x16xf32> to vector<2x16xf32>
    %127 = arith.addf %125, %126 : vector<2x16xf32>
    %cst_45 = arith.constant dense<0xFF800000> : vector<2xf32>
    %128 = vector.multi_reduction <maximumf>, %127, %cst_45 [1] : vector<2x16xf32> to vector<2xf32>
    %129 = vector.shape_cast %128 : vector<2xf32> to vector<2x1xf32>
    %130 = vector.broadcast %129 : vector<2x1xf32> to vector<2x16xf32>
    %131 = arith.subf %127, %130 : vector<2x16xf32>
    %132 = math.exp %131 : vector<2x16xf32>
    %cst_46 = arith.constant dense<0.000000e+00> : vector<2xf32>
    %133 = vector.multi_reduction <add>, %132, %cst_46 [1] : vector<2x16xf32> to vector<2xf32>
    %134 = vector.shape_cast %133 : vector<2xf32> to vector<2x1xf32>
    %135 = math.log %134 : vector<2x1xf32>
    %136 = arith.addf %135, %129 : vector<2x1xf32>
    %137 = vector.broadcast %136 : vector<2x1xf32> to vector<2x16xf32>
    %138 = arith.subf %127, %137 : vector<2x16xf32>
    %139 = tpu.reduce_index %138 {axis = 1 : i32, kind = #tpu.reduction_kind<arg_max>} : vector<2x16xf32> -> vector<2xi32>
    %140 = vector.shape_cast %139 : vector<2xi32> to vector<2x1xi32>
    %141 = vector.broadcast %140 : vector<2x1xi32> to vector<2x16xi32>
    %142 = arith.cmpi eq, %16, %141 : vector<2x16xi32>
    %cst_47 = arith.constant 1.000000e+00 : f32
    %cst_48 = arith.constant 0.000000e+00 : f32
    %143 = vector.broadcast %cst_47 : f32 to vector<2x16xf32>
    %144 = vector.broadcast %cst_48 : f32 to vector<2x16xf32>
    %145 = arith.select %142, %143, %144 : vector<2x16xi1>, vector<2x16xf32>
    %146 = tpu.concatenate %145, %123, %104 in 1 : vector<2x16xf32>, vector<2x32xf32>, vector<2x32xf32> -> vector<2x80xf32>
    %cst_49 = arith.constant dense<0.000000e+00> : vector<2x128xf32>
    %147 = tpu.matmul %146, %10, %cst_49 {dimension_numbers = #tpu.dot_dimension_numbers<[1], [0], [0], [1], [0, 0, 1, 1], [], []>} : vector<2x80xf32>, vector<80x128xf32>, vector<2x128xf32> -> vector<2x128xf32>
    %148 = vector.broadcast %11 : vector<1x128xf32> to vector<2x128xf32>
    %149 = arith.addf %147, %148 : vector<2x128xf32>
    %150 = arith.negf %149 : vector<2x128xf32>
    %151 = math.exp %150 : vector<2x128xf32>
    %cst_50 = arith.constant 1.000000e+00 : f32
    %152 = vector.broadcast %cst_50 : f32 to vector<2x128xf32>
    %153 = arith.addf %152, %151 : vector<2x128xf32>
    %154 = arith.divf %152, %153 : vector<2x128xf32>
    %155 = vector.extract_strided_slice %149 {offsets = [0, 64], sizes = [2, 32], strides = [1, 1]} : vector<2x128xf32> to vector<2x32xf32>
    %156 = math.tanh %155 : vector<2x32xf32>
    %157 = vector.extract_strided_slice %154 {offsets = [0, 0], sizes = [2, 32], strides = [1, 1]} : vector<2x128xf32> to vector<2x32xf32>
    %158 = vector.extract_strided_slice %154 {offsets = [0, 32], sizes = [2, 32], strides = [1, 1]} : vector<2x128xf32> to vector<2x32xf32>
    %159 = vector.extract_strided_slice %154 {offsets = [0, 96], sizes = [2, 32], strides = [1, 1]} : vector<2x128xf32> to vector<2x32xf32>
    %160 = arith.mulf %158, %102 : vector<2x32xf32>
    %161 = arith.mulf %157, %156 : vector<2x32xf32>
    %162 = arith.addf %160, %161 : vector<2x32xf32>
    %163 = math.tanh %162 : vector<2x32xf32>
    %164 = arith.mulf %159, %163 : vector<2x32xf32>
    %cst_51 = arith.constant dense<0.000000e+00> : vector<2x32xf32>
    %165 = tpu.matmul %164, %12, %cst_51 {dimension_numbers = #tpu.dot_dimension_numbers<[1], [0], [0], [1], [0, 0, 1, 1], [], []>} : vector<2x32xf32>, vector<32x32xf32>, vector<2x32xf32> -> vector<2x32xf32>
    %166 = vector.broadcast %13 : vector<1x32xf32> to vector<2x32xf32>
    %167 = arith.addf %165, %166 : vector<2x32xf32>
    %cst_52 = arith.constant 0.000000e+00 : f32
    %168 = vector.broadcast %cst_52 : f32 to vector<2x32xf32>
    %169 = arith.maximumf %167, %168 : vector<2x32xf32>
    %170 = vector.shape_cast %169 : vector<2x32xf32> to vector<2x1x32xf32>
    "tpu.trace_start"() <{level = 10 : i32, message = "bsa,bta->bst"}> : () -> ()
    %cst_53 = arith.constant dense<0.000000e+00> : vector<2x1x8xf32>
    %171 = tpu.matmul %170, %9, %cst_53 {dimension_numbers = #tpu.dot_dimension_numbers<[2], [2], [1], [1], [0, 0, 0, 1, 1, 1], [0], [0]>} : vector<2x1x32xf32>, vector<2x8x32xf32>, vector<2x1x8xf32> -> vector<2x1x8xf32>
    "tpu.trace_stop"() : () -> ()
    %cst_54 = arith.constant dense<0xFF800000> : vector<2x1xf32>
    %172 = vector.multi_reduction <maximumf>, %171, %cst_54 [2] : vector<2x1x8xf32> to vector<2x1xf32>
    %173 = vector.shape_cast %172 : vector<2x1xf32> to vector<2x1x1xf32>
    %174 = vector.broadcast %173 : vector<2x1x1xf32> to vector<2x1x8xf32>
    %175 = arith.subf %171, %174 : vector<2x1x8xf32>
    %176 = math.exp %175 : vector<2x1x8xf32>
    %cst_55 = arith.constant dense<0.000000e+00> : vector<2x1xf32>
    %177 = vector.multi_reduction <add>, %176, %cst_55 [2] : vector<2x1x8xf32> to vector<2x1xf32>
    %178 = vector.shape_cast %177 : vector<2x1xf32> to vector<2x1x1xf32>
    %179 = tpu.reciprocal %178 {approx = true} : vector<2x1x1xf32> -> vector<2x1x1xf32>
    %180 = vector.broadcast %179 : vector<2x1x1xf32> to vector<2x1x8xf32>
    %181 = arith.mulf %176, %180 : vector<2x1x8xf32>
    "tpu.trace_start"() <{level = 10 : i32, message = "bst,btd->bsd"}> : () -> ()
    %cst_56 = arith.constant dense<0.000000e+00> : vector<2x1x32xf32>
    %182 = tpu.matmul %181, %0, %cst_56 {dimension_numbers = #tpu.dot_dimension_numbers<[2], [1], [1], [2], [0, 0, 0, 1, 1, 2], [0], [0]>} : vector<2x1x8xf32>, vector<2x8x32xf32>, vector<2x1x32xf32> -> vector<2x1x32xf32>
    "tpu.trace_stop"() : () -> ()
    %183 = vector.shape_cast %182 : vector<2x1x32xf32> to vector<2x32xf32>
    %184 = tpu.concatenate %164, %183 in 1 : vector<2x32xf32>, vector<2x32xf32> -> vector<2x64xf32>
    %cst_57 = arith.constant dense<0.000000e+00> : vector<2x16xf32>
    %185 = tpu.matmul %184, %14, %cst_57 {dimension_numbers = #tpu.dot_dimension_numbers<[1], [0], [0], [1], [0, 0, 1, 1], [], []>} : vector<2x64xf32>, vector<64x16xf32>, vector<2x16xf32> -> vector<2x16xf32>
    %186 = vector.broadcast %15 : vector<1x16xf32> to vector<2x16xf32>
    %187 = arith.addf %185, %186 : vector<2x16xf32>
    %cst_58 = arith.constant dense<0xFF800000> : vector<2xf32>
    %188 = vector.multi_reduction <maximumf>, %187, %cst_58 [1] : vector<2x16xf32> to vector<2xf32>
    %189 = vector.shape_cast %188 : vector<2xf32> to vector<2x1xf32>
    %190 = vector.broadcast %189 : vector<2x1xf32> to vector<2x16xf32>
    %191 = arith.subf %187, %190 : vector<2x16xf32>
    %192 = math.exp %191 : vector<2x16xf32>
    %cst_59 = arith.constant dense<0.000000e+00> : vector<2xf32>
    %193 = vector.multi_reduction <add>, %192, %cst_59 [1] : vector<2x16xf32> to vector<2xf32>
    %194 = vector.shape_cast %193 : vector<2xf32> to vector<2x1xf32>
    %195 = math.log %194 : vector<2x1xf32>
    %196 = arith.addf %195, %189 : vector<2x1xf32>
    %197 = vector.broadcast %196 : vector<2x1xf32> to vector<2x16xf32>
    %198 = arith.subf %187, %197 : vector<2x16xf32>
    %199 = tpu.reduce_index %198 {axis = 1 : i32, kind = #tpu.reduction_kind<arg_max>} : vector<2x16xf32> -> vector<2xi32>
    %200 = vector.shape_cast %199 : vector<2xi32> to vector<2x1xi32>
    %201 = vector.broadcast %200 : vector<2x1xi32> to vector<2x16xi32>
    %202 = arith.cmpi eq, %16, %201 : vector<2x16xi32>
    %cst_60 = arith.constant 1.000000e+00 : f32
    %cst_61 = arith.constant 0.000000e+00 : f32
    %203 = vector.broadcast %cst_60 : f32 to vector<2x16xf32>
    %204 = vector.broadcast %cst_61 : f32 to vector<2x16xf32>
    %205 = arith.select %202, %203, %204 : vector<2x16xi1>, vector<2x16xf32>
    %206 = tpu.concatenate %205, %183, %164 in 1 : vector<2x16xf32>, vector<2x32xf32>, vector<2x32xf32> -> vector<2x80xf32>
    %cst_62 = arith.constant dense<0.000000e+00> : vector<2x128xf32>
    %207 = tpu.matmul %206, %10, %cst_62 {dimension_numbers = #tpu.dot_dimension_numbers<[1], [0], [0], [1], [0, 0, 1, 1], [], []>} : vector<2x80xf32>, vector<80x128xf32>, vector<2x128xf32> -> vector<2x128xf32>
    %208 = vector.broadcast %11 : vector<1x128xf32> to vector<2x128xf32>
    %209 = arith.addf %207, %208 : vector<2x128xf32>
    %210 = arith.negf %209 : vector<2x128xf32>
    %211 = math.exp %210 : vector<2x128xf32>
    %cst_63 = arith.constant 1.000000e+00 : f32
    %212 = vector.broadcast %cst_63 : f32 to vector<2x128xf32>
    %213 = arith.addf %212, %211 : vector<2x128xf32>
    %214 = arith.divf %212, %213 : vector<2x128xf32>
    %215 = vector.extract_strided_slice %209 {offsets = [0, 64], sizes = [2, 32], strides = [1, 1]} : vector<2x128xf32> to vector<2x32xf32>
    %216 = math.tanh %215 : vector<2x32xf32>
    %217 = vector.extract_strided_slice %214 {offsets = [0, 0], sizes = [2, 32], strides = [1, 1]} : vector<2x128xf32> to vector<2x32xf32>
    %218 = vector.extract_strided_slice %214 {offsets = [0, 32], sizes = [2, 32], strides = [1, 1]} : vector<2x128xf32> to vector<2x32xf32>
    %219 = vector.extract_strided_slice %214 {offsets = [0, 96], sizes = [2, 32], strides = [1, 1]} : vector<2x128xf32> to vector<2x32xf32>
    %220 = arith.mulf %218, %162 : vector<2x32xf32>
    %221 = arith.mulf %217, %216 : vector<2x32xf32>
    %222 = arith.addf %220, %221 : vector<2x32xf32>
    %223 = math.tanh %222 : vector<2x32xf32>
    %224 = arith.mulf %219, %223 : vector<2x32xf32>
    %cst_64 = arith.constant dense<0.000000e+00> : vector<2x32xf32>
    %225 = tpu.matmul %224, %12, %cst_64 {dimension_numbers = #tpu.dot_dimension_numbers<[1], [0], [0], [1], [0, 0, 1, 1], [], []>} : vector<2x32xf32>, vector<32x32xf32>, vector<2x32xf32> -> vector<2x32xf32>
    %226 = vector.broadcast %13 : vector<1x32xf32> to vector<2x32xf32>
    %227 = arith.addf %225, %226 : vector<2x32xf32>
    %cst_65 = arith.constant 0.000000e+00 : f32
    %228 = vector.broadcast %cst_65 : f32 to vector<2x32xf32>
    %229 = arith.maximumf %227, %228 : vector<2x32xf32>
    %230 = vector.shape_cast %229 : vector<2x32xf32> to vector<2x1x32xf32>
    "tpu.trace_start"() <{level = 10 : i32, message = "bsa,bta->bst"}> : () -> ()
    %cst_66 = arith.constant dense<0.000000e+00> : vector<2x1x8xf32>
    %231 = tpu.matmul %230, %9, %cst_66 {dimension_numbers = #tpu.dot_dimension_numbers<[2], [2], [1], [1], [0, 0, 0, 1, 1, 1], [0], [0]>} : vector<2x1x32xf32>, vector<2x8x32xf32>, vector<2x1x8xf32> -> vector<2x1x8xf32>
    "tpu.trace_stop"() : () -> ()
    %cst_67 = arith.constant dense<0xFF800000> : vector<2x1xf32>
    %232 = vector.multi_reduction <maximumf>, %231, %cst_67 [2] : vector<2x1x8xf32> to vector<2x1xf32>
    %233 = vector.shape_cast %232 : vector<2x1xf32> to vector<2x1x1xf32>
    %234 = vector.broadcast %233 : vector<2x1x1xf32> to vector<2x1x8xf32>
    %235 = arith.subf %231, %234 : vector<2x1x8xf32>
    %236 = math.exp %235 : vector<2x1x8xf32>
    %cst_68 = arith.constant dense<0.000000e+00> : vector<2x1xf32>
    %237 = vector.multi_reduction <add>, %236, %cst_68 [2] : vector<2x1x8xf32> to vector<2x1xf32>
    %238 = vector.shape_cast %237 : vector<2x1xf32> to vector<2x1x1xf32>
    %239 = tpu.reciprocal %238 {approx = true} : vector<2x1x1xf32> -> vector<2x1x1xf32>
    %240 = vector.broadcast %239 : vector<2x1x1xf32> to vector<2x1x8xf32>
    %241 = arith.mulf %236, %240 : vector<2x1x8xf32>
    "tpu.trace_start"() <{level = 10 : i32, message = "bst,btd->bsd"}> : () -> ()
    %cst_69 = arith.constant dense<0.000000e+00> : vector<2x1x32xf32>
    %242 = tpu.matmul %241, %0, %cst_69 {dimension_numbers = #tpu.dot_dimension_numbers<[2], [1], [1], [2], [0, 0, 0, 1, 1, 2], [0], [0]>} : vector<2x1x8xf32>, vector<2x8x32xf32>, vector<2x1x32xf32> -> vector<2x1x32xf32>
    "tpu.trace_stop"() : () -> ()
    %243 = vector.shape_cast %242 : vector<2x1x32xf32> to vector<2x32xf32>
    %244 = tpu.concatenate %224, %243 in 1 : vector<2x32xf32>, vector<2x32xf32> -> vector<2x64xf32>
    %cst_70 = arith.constant dense<0.000000e+00> : vector<2x16xf32>
    %245 = tpu.matmul %244, %14, %cst_70 {dimension_numbers = #tpu.dot_dimension_numbers<[1], [0], [0], [1], [0, 0, 1, 1], [], []>} : vector<2x64xf32>, vector<64x16xf32>, vector<2x16xf32> -> vector<2x16xf32>
    %246 = vector.broadcast %15 : vector<1x16xf32> to vector<2x16xf32>
    %247 = arith.addf %245, %246 : vector<2x16xf32>
    %cst_71 = arith.constant dense<0xFF800000> : vector<2xf32>
    %248 = vector.multi_reduction <maximumf>, %247, %cst_71 [1] : vector<2x16xf32> to vector<2xf32>
    %249 = vector.shape_cast %248 : vector<2xf32> to vector<2x1xf32>
    %250 = vector.broadcast %249 : vector<2x1xf32> to vector<2x16xf32>
    %251 = arith.subf %247, %250 : vector<2x16xf32>
    %252 = math.exp %251 : vector<2x16xf32>
    %cst_72 = arith.constant dense<0.000000e+00> : vector<2xf32>
    %253 = vector.multi_reduction <add>, %252, %cst_72 [1] : vector<2x16xf32> to vector<2xf32>
    %254 = vector.shape_cast %253 : vector<2xf32> to vector<2x1xf32>
    %255 = math.log %254 : vector<2x1xf32>
    %256 = arith.addf %255, %249 : vector<2x1xf32>
    %257 = vector.broadcast %256 : vector<2x1xf32> to vector<2x16xf32>
    %258 = arith.subf %247, %257 : vector<2x16xf32>
    %259 = tpu.reduce_index %258 {axis = 1 : i32, kind = #tpu.reduction_kind<arg_max>} : vector<2x16xf32> -> vector<2xi32>
    %260 = vector.shape_cast %259 : vector<2xi32> to vector<2x1xi32>
    %261 = vector.broadcast %260 : vector<2x1xi32> to vector<2x16xi32>
    %262 = arith.cmpi eq, %16, %261 : vector<2x16xi32>
    %cst_73 = arith.constant 1.000000e+00 : f32
    %cst_74 = arith.constant 0.000000e+00 : f32
    %263 = vector.broadcast %cst_73 : f32 to vector<2x16xf32>
    %264 = vector.broadcast %cst_74 : f32 to vector<2x16xf32>
    %265 = arith.select %262, %263, %264 : vector<2x16xi1>, vector<2x16xf32>
    %266 = tpu.concatenate %265, %243, %224 in 1 : vector<2x16xf32>, vector<2x32xf32>, vector<2x32xf32> -> vector<2x80xf32>
    %cst_75 = arith.constant dense<0.000000e+00> : vector<2x128xf32>
    %267 = tpu.matmul %266, %10, %cst_75 {dimension_numbers = #tpu.dot_dimension_numbers<[1], [0], [0], [1], [0, 0, 1, 1], [], []>} : vector<2x80xf32>, vector<80x128xf32>, vector<2x128xf32> -> vector<2x128xf32>
    %268 = vector.broadcast %11 : vector<1x128xf32> to vector<2x128xf32>
    %269 = arith.addf %267, %268 : vector<2x128xf32>
    %270 = arith.negf %269 : vector<2x128xf32>
    %271 = math.exp %270 : vector<2x128xf32>
    %cst_76 = arith.constant 1.000000e+00 : f32
    %272 = vector.broadcast %cst_76 : f32 to vector<2x128xf32>
    %273 = arith.addf %272, %271 : vector<2x128xf32>
    %274 = arith.divf %272, %273 : vector<2x128xf32>
    %275 = vector.extract_strided_slice %269 {offsets = [0, 64], sizes = [2, 32], strides = [1, 1]} : vector<2x128xf32> to vector<2x32xf32>
    %276 = math.tanh %275 : vector<2x32xf32>
    %277 = vector.extract_strided_slice %274 {offsets = [0, 0], sizes = [2, 32], strides = [1, 1]} : vector<2x128xf32> to vector<2x32xf32>
    %278 = vector.extract_strided_slice %274 {offsets = [0, 32], sizes = [2, 32], strides = [1, 1]} : vector<2x128xf32> to vector<2x32xf32>
    %279 = vector.extract_strided_slice %274 {offsets = [0, 96], sizes = [2, 32], strides = [1, 1]} : vector<2x128xf32> to vector<2x32xf32>
    %280 = arith.mulf %278, %222 : vector<2x32xf32>
    %281 = arith.mulf %277, %276 : vector<2x32xf32>
    %282 = arith.addf %280, %281 : vector<2x32xf32>
    %283 = math.tanh %282 : vector<2x32xf32>
    %284 = arith.mulf %279, %283 : vector<2x32xf32>
    %cst_77 = arith.constant dense<0.000000e+00> : vector<2x32xf32>
    %285 = tpu.matmul %284, %12, %cst_77 {dimension_numbers = #tpu.dot_dimension_numbers<[1], [0], [0], [1], [0, 0, 1, 1], [], []>} : vector<2x32xf32>, vector<32x32xf32>, vector<2x32xf32> -> vector<2x32xf32>
    %286 = vector.broadcast %13 : vector<1x32xf32> to vector<2x32xf32>
    %287 = arith.addf %285, %286 : vector<2x32xf32>
    %cst_78 = arith.constant 0.000000e+00 : f32
    %288 = vector.broadcast %cst_78 : f32 to vector<2x32xf32>
    %289 = arith.maximumf %287, %288 : vector<2x32xf32>
    %290 = vector.shape_cast %289 : vector<2x32xf32> to vector<2x1x32xf32>
    "tpu.trace_start"() <{level = 10 : i32, message = "bsa,bta->bst"}> : () -> ()
    %cst_79 = arith.constant dense<0.000000e+00> : vector<2x1x8xf32>
    %291 = tpu.matmul %290, %9, %cst_79 {dimension_numbers = #tpu.dot_dimension_numbers<[2], [2], [1], [1], [0, 0, 0, 1, 1, 1], [0], [0]>} : vector<2x1x32xf32>, vector<2x8x32xf32>, vector<2x1x8xf32> -> vector<2x1x8xf32>
    "tpu.trace_stop"() : () -> ()
    %cst_80 = arith.constant dense<0xFF800000> : vector<2x1xf32>
    %292 = vector.multi_reduction <maximumf>, %291, %cst_80 [2] : vector<2x1x8xf32> to vector<2x1xf32>
    %293 = vector.shape_cast %292 : vector<2x1xf32> to vector<2x1x1xf32>
    %294 = vector.broadcast %293 : vector<2x1x1xf32> to vector<2x1x8xf32>
    %295 = arith.subf %291, %294 : vector<2x1x8xf32>
    %296 = math.exp %295 : vector<2x1x8xf32>
    %cst_81 = arith.constant dense<0.000000e+00> : vector<2x1xf32>
    %297 = vector.multi_reduction <add>, %296, %cst_81 [2] : vector<2x1x8xf32> to vector<2x1xf32>
    %298 = vector.shape_cast %297 : vector<2x1xf32> to vector<2x1x1xf32>
    %299 = tpu.reciprocal %298 {approx = true} : vector<2x1x1xf32> -> vector<2x1x1xf32>
    %300 = vector.broadcast %299 : vector<2x1x1xf32> to vector<2x1x8xf32>
    %301 = arith.mulf %296, %300 : vector<2x1x8xf32>
    "tpu.trace_start"() <{level = 10 : i32, message = "bst,btd->bsd"}> : () -> ()
    %cst_82 = arith.constant dense<0.000000e+00> : vector<2x1x32xf32>
    %302 = tpu.matmul %301, %0, %cst_82 {dimension_numbers = #tpu.dot_dimension_numbers<[2], [1], [1], [2], [0, 0, 0, 1, 1, 2], [0], [0]>} : vector<2x1x8xf32>, vector<2x8x32xf32>, vector<2x1x32xf32> -> vector<2x1x32xf32>
    "tpu.trace_stop"() : () -> ()
    %303 = vector.shape_cast %302 : vector<2x1x32xf32> to vector<2x32xf32>
    %304 = tpu.concatenate %284, %303 in 1 : vector<2x32xf32>, vector<2x32xf32> -> vector<2x64xf32>
    %cst_83 = arith.constant dense<0.000000e+00> : vector<2x16xf32>
    %305 = tpu.matmul %304, %14, %cst_83 {dimension_numbers = #tpu.dot_dimension_numbers<[1], [0], [0], [1], [0, 0, 1, 1], [], []>} : vector<2x64xf32>, vector<64x16xf32>, vector<2x16xf32> -> vector<2x16xf32>
    %306 = vector.broadcast %15 : vector<1x16xf32> to vector<2x16xf32>
    %307 = arith.addf %305, %306 : vector<2x16xf32>
    %cst_84 = arith.constant dense<0xFF800000> : vector<2xf32>
    %308 = vector.multi_reduction <maximumf>, %307, %cst_84 [1] : vector<2x16xf32> to vector<2xf32>
    %309 = vector.shape_cast %308 : vector<2xf32> to vector<2x1xf32>
    %310 = vector.broadcast %309 : vector<2x1xf32> to vector<2x16xf32>
    %311 = arith.subf %307, %310 : vector<2x16xf32>
    %312 = math.exp %311 : vector<2x16xf32>
    %cst_85 = arith.constant dense<0.000000e+00> : vector<2xf32>
    %313 = vector.multi_reduction <add>, %312, %cst_85 [1] : vector<2x16xf32> to vector<2xf32>
    %314 = vector.shape_cast %313 : vector<2xf32> to vector<2x1xf32>
    %315 = math.log %314 : vector<2x1xf32>
    %316 = arith.addf %315, %309 : vector<2x1xf32>
    %317 = vector.broadcast %316 : vector<2x1xf32> to vector<2x16xf32>
    %318 = arith.subf %307, %317 : vector<2x16xf32>
    %319 = tpu.reduce_index %318 {axis = 1 : i32, kind = #tpu.reduction_kind<arg_max>} : vector<2x16xf32> -> vector<2xi32>
    %320 = vector.shape_cast %319 : vector<2xi32> to vector<2x1xi32>
    %321 = vector.broadcast %320 : vector<2x1xi32> to vector<2x16xi32>
    %322 = arith.cmpi eq, %16, %321 : vector<2x16xi32>
    %cst_86 = arith.constant 1.000000e+00 : f32
    %cst_87 = arith.constant 0.000000e+00 : f32
    %323 = vector.broadcast %cst_86 : f32 to vector<2x16xf32>
    %324 = vector.broadcast %cst_87 : f32 to vector<2x16xf32>
    %325 = arith.select %322, %323, %324 : vector<2x16xi1>, vector<2x16xf32>
    %326 = tpu.concatenate %325, %303, %284 in 1 : vector<2x16xf32>, vector<2x32xf32>, vector<2x32xf32> -> vector<2x80xf32>
    %cst_88 = arith.constant dense<0.000000e+00> : vector<2x128xf32>
    %327 = tpu.matmul %326, %10, %cst_88 {dimension_numbers = #tpu.dot_dimension_numbers<[1], [0], [0], [1], [0, 0, 1, 1], [], []>} : vector<2x80xf32>, vector<80x128xf32>, vector<2x128xf32> -> vector<2x128xf32>
    %328 = vector.broadcast %11 : vector<1x128xf32> to vector<2x128xf32>
    %329 = arith.addf %327, %328 : vector<2x128xf32>
    %330 = arith.negf %329 : vector<2x128xf32>
    %331 = math.exp %330 : vector<2x128xf32>
    %cst_89 = arith.constant 1.000000e+00 : f32
    %332 = vector.broadcast %cst_89 : f32 to vector<2x128xf32>
    %333 = arith.addf %332, %331 : vector<2x128xf32>
    %334 = arith.divf %332, %333 : vector<2x128xf32>
    %335 = vector.extract_strided_slice %329 {offsets = [0, 64], sizes = [2, 32], strides = [1, 1]} : vector<2x128xf32> to vector<2x32xf32>
    %336 = math.tanh %335 : vector<2x32xf32>
    %337 = vector.extract_strided_slice %334 {offsets = [0, 0], sizes = [2, 32], strides = [1, 1]} : vector<2x128xf32> to vector<2x32xf32>
    %338 = vector.extract_strided_slice %334 {offsets = [0, 32], sizes = [2, 32], strides = [1, 1]} : vector<2x128xf32> to vector<2x32xf32>
    %339 = vector.extract_strided_slice %334 {offsets = [0, 96], sizes = [2, 32], strides = [1, 1]} : vector<2x128xf32> to vector<2x32xf32>
    %340 = arith.mulf %338, %282 : vector<2x32xf32>
    %341 = arith.mulf %337, %336 : vector<2x32xf32>
    %342 = arith.addf %340, %341 : vector<2x32xf32>
    %343 = math.tanh %342 : vector<2x32xf32>
    %344 = arith.mulf %339, %343 : vector<2x32xf32>
    %cst_90 = arith.constant dense<0.000000e+00> : vector<2x32xf32>
    %345 = tpu.matmul %344, %12, %cst_90 {dimension_numbers = #tpu.dot_dimension_numbers<[1], [0], [0], [1], [0, 0, 1, 1], [], []>} : vector<2x32xf32>, vector<32x32xf32>, vector<2x32xf32> -> vector<2x32xf32>
    %346 = vector.broadcast %13 : vector<1x32xf32> to vector<2x32xf32>
    %347 = arith.addf %345, %346 : vector<2x32xf32>
    %cst_91 = arith.constant 0.000000e+00 : f32
    %348 = vector.broadcast %cst_91 : f32 to vector<2x32xf32>
    %349 = arith.maximumf %347, %348 : vector<2x32xf32>
    %350 = vector.shape_cast %349 : vector<2x32xf32> to vector<2x1x32xf32>
    "tpu.trace_start"() <{level = 10 : i32, message = "bsa,bta->bst"}> : () -> ()
    %cst_92 = arith.constant dense<0.000000e+00> : vector<2x1x8xf32>
    %351 = tpu.matmul %350, %9, %cst_92 {dimension_numbers = #tpu.dot_dimension_numbers<[2], [2], [1], [1], [0, 0, 0, 1, 1, 1], [0], [0]>} : vector<2x1x32xf32>, vector<2x8x32xf32>, vector<2x1x8xf32> -> vector<2x1x8xf32>
    "tpu.trace_stop"() : () -> ()
    %cst_93 = arith.constant dense<0xFF800000> : vector<2x1xf32>
    %352 = vector.multi_reduction <maximumf>, %351, %cst_93 [2] : vector<2x1x8xf32> to vector<2x1xf32>
    %353 = vector.shape_cast %352 : vector<2x1xf32> to vector<2x1x1xf32>
    %354 = vector.broadcast %353 : vector<2x1x1xf32> to vector<2x1x8xf32>
    %355 = arith.subf %351, %354 : vector<2x1x8xf32>
    %356 = math.exp %355 : vector<2x1x8xf32>
    %cst_94 = arith.constant dense<0.000000e+00> : vector<2x1xf32>
    %357 = vector.multi_reduction <add>, %356, %cst_94 [2] : vector<2x1x8xf32> to vector<2x1xf32>
    %358 = vector.shape_cast %357 : vector<2x1xf32> to vector<2x1x1xf32>
    %359 = tpu.reciprocal %358 {approx = true} : vector<2x1x1xf32> -> vector<2x1x1xf32>
    %360 = vector.broadcast %359 : vector<2x1x1xf32> to vector<2x1x8xf32>
    %361 = arith.mulf %356, %360 : vector<2x1x8xf32>
    "tpu.trace_start"() <{level = 10 : i32, message = "bst,btd->bsd"}> : () -> ()
    %cst_95 = arith.constant dense<0.000000e+00> : vector<2x1x32xf32>
    %362 = tpu.matmul %361, %0, %cst_95 {dimension_numbers = #tpu.dot_dimension_numbers<[2], [1], [1], [2], [0, 0, 0, 1, 1, 2], [0], [0]>} : vector<2x1x8xf32>, vector<2x8x32xf32>, vector<2x1x32xf32> -> vector<2x1x32xf32>
    "tpu.trace_stop"() : () -> ()
    %363 = vector.shape_cast %362 : vector<2x1x32xf32> to vector<2x32xf32>
    %364 = tpu.concatenate %344, %363 in 1 : vector<2x32xf32>, vector<2x32xf32> -> vector<2x64xf32>
    %cst_96 = arith.constant dense<0.000000e+00> : vector<2x16xf32>
    %365 = tpu.matmul %364, %14, %cst_96 {dimension_numbers = #tpu.dot_dimension_numbers<[1], [0], [0], [1], [0, 0, 1, 1], [], []>} : vector<2x64xf32>, vector<64x16xf32>, vector<2x16xf32> -> vector<2x16xf32>
    %366 = vector.broadcast %15 : vector<1x16xf32> to vector<2x16xf32>
    %367 = arith.addf %365, %366 : vector<2x16xf32>
    %cst_97 = arith.constant dense<0xFF800000> : vector<2xf32>
    %368 = vector.multi_reduction <maximumf>, %367, %cst_97 [1] : vector<2x16xf32> to vector<2xf32>
    %369 = vector.shape_cast %368 : vector<2xf32> to vector<2x1xf32>
    %370 = vector.broadcast %369 : vector<2x1xf32> to vector<2x16xf32>
    %371 = arith.subf %367, %370 : vector<2x16xf32>
    %372 = math.exp %371 : vector<2x16xf32>
    %cst_98 = arith.constant dense<0.000000e+00> : vector<2xf32>
    %373 = vector.multi_reduction <add>, %372, %cst_98 [1] : vector<2x16xf32> to vector<2xf32>
    %374 = vector.shape_cast %373 : vector<2xf32> to vector<2x1xf32>
    %375 = math.log %374 : vector<2x1xf32>
    %376 = arith.addf %375, %369 : vector<2x1xf32>
    %377 = vector.broadcast %376 : vector<2x1xf32> to vector<2x16xf32>
    %378 = arith.subf %367, %377 : vector<2x16xf32>
    %379 = tpu.concatenate %78, %138, %198, %258, %318, %378 in 1 : vector<2x16xf32>, vector<2x16xf32>, vector<2x16xf32>, vector<2x16xf32>, vector<2x16xf32>, vector<2x16xf32> -> vector<2x96xf32>
    %c0_99 = arith.constant 0 : index
    %c0_100 = arith.constant 0 : index
    %380 = vector.load %arg9[%c0_99, %c0_100] : memref<2x96xf32, #tpu.memory_space<vmem>>, vector<2x96xf32>
    tpu.vector_store %arg9[%c0_99, %c0_100], %379 {strides = array<i32>} : memref<2x96xf32, #tpu.memory_space<vmem>>, vector<2x96xf32>,
    return
  }
}

</mosaic_0001>

<bundles_post_ra>
// kernel: speller_forward.1
= control target key start
LH: loop header
LB: loop body
LE: loop exit
PB: predicated region body
PF: predicated region fallthrough
CT: control target
= control target key end

     0   :  { %14 = vsyncpa [#allocation3], 0  ;;  %s5923_s0 = inlined_call_operand.hbm [shape: f32[2,8,32], index: 0, kind: input, shape index: {}]   ;;  %s5924_s1 = inlined_call_operand.vmem [shape: f32[80,128], index: 1, kind: input, shape index: {}]   ;;  %s5925_s2 = inlined_call_operand.vmem [shape: f32[1,128], index: 2, kind: input, shape index: {}]   ;;  %s5926_s3 = inlined_call_operand.hbm [shape: f32[32,32], index: 3, kind: input, shape index: {}]   ;;  %s5927_s4 = inlined_call_operand.vmem [shape: f32[1,32], index: 4, kind: input, shape index: {}]   ;;  %s5928_s5 = inlined_call_operand.hbm [shape: f32[32,32], index: 5, kind: input, shape index: {}]   ;;  %s5929_s6 = inlined_call_operand.vmem [shape: f32[1,32], index: 6, kind: input, shape index: {}]   ;;  %s5930_s7 = inlined_call_operand.vmem [shape: f32[64,16], index: 7, kind: input, shape index: {}]   ;;  %s5931_s8 = inlined_call_operand.vmem [shape: f32[1,16], index: 8, kind: input, shape index: {}]   ;;  %s5932_s9 = inlined_call_operand.vmem [shape: f32[2,96], index: 9, kind: output, shape index: {}]  }
   0x1   :  { %15 = vsyncpa [#allocation5], 0  ;;  %s4897_s30 = smov [#allocation4]   ;;  %s4898_s11 = smov [#allocation2]  }
   0x2   :  { %s37_s10 = sshll.u32 %s4897_s30, 4  ;;  %s21_s12 = sshll.u32 %s4898_s11, 4  ;;  %s38_s10 = int_to_ptr.vmem [resolvable:$true] %s37_s10  ;;  %s22_s12 = int_to_ptr.vmem [resolvable:$true] %s21_s12 }
   0x3   :  { %s4841_s13 = scalar_lea.vmem %s38_s10, 512  ;;  %p4846_p1 = scmp.lt.s32.totalorder %s38_s10, %s38_s10 }
   0x4   :  { %p4842_p0 = scmp.ne.s32.totalorder %s38_s10, %s4841_s13  ;;  %p4847_p2 = scmp.lt.s32.totalorder %s4841_s13, %s4841_s13 }
   0x6   :  { %p4848_p3 = por %p4847_p2, %p4846_p1 }
   0x8   :  { %p4849_p4 = pnand %p4848_p3, %p4842_p0 }
   0xa   :  { %4852 = shalt.err (!%p4849_p4)
}
   0xb   :  { %s4899_s14 = smov 128   ;;  %s4900_s15 = smov 8  }
   0xc   :  { %43 = dma.hbm_to_vmem [thread:$0]  %s5926_s3, 512, %s38_s10, [#allocation5], %s4899_s14, %s4899_s14, %s4900_s15  }
   0xd   :  { %s4861_s18 = scalar_lea.vmem %s22_s12, 256  ;;  %p4866_p6 = scmp.lt.s32.totalorder %s22_s12, %s22_s12 }
   0xe   :  { %p4862_p5 = scmp.ne.s32.totalorder %s22_s12, %s4861_s18  ;;  %p4867_p7 = scmp.lt.s32.totalorder %s4861_s18, %s4861_s18 }
  0x10   :  { %p4868_p8 = por %p4867_p7, %p4866_p6 }
  0x12   :  { %p4869_p9 = pnand %p4868_p8, %p4862_p5 }
  0x14   :  { %4872 = shalt.err (!%p4869_p9)
}
  0x15   :  { %27 = dma.hbm_to_vmem [thread:$0]  %s5923_s0, 256, %s22_s12, [#allocation3], %s4899_s14, %s4899_s14, %s4900_s15  }
  0x16   :  { %s4901_s21 = smov [#allocation6]  }
  0x17   :  { %s51_s22 = sshll.u32 %s4901_s21, 4  ;;  %s52_s22 = int_to_ptr.vmem [resolvable:$true] %s51_s22 }
  0x18   :  { %s4881_s23 = scalar_lea.vmem %s52_s22, 512  ;;  %p4886_p11 = scmp.lt.s32.totalorder %s52_s22, %s52_s22 }
  0x19   :  { %p4882_p10 = scmp.ne.s32.totalorder %s52_s22, %s4881_s23  ;;  %p4887_p12 = scmp.lt.s32.totalorder %s4881_s23, %s4881_s23 }
  0x1b   :  { %p4888_p13 = por %p4887_p12, %p4886_p11 }
  0x1d   :  { %p4889_p0 = pnand %p4888_p13, %p4882_p10 }
  0x1f   :  { %4892 = shalt.err (!%p4889_p0)
}
  0x20   :  { %57 = dma.hbm_to_vmem [thread:$0]  %s5928_s5, 512, %s52_s22, [#allocation5], %s4899_s14, %s4899_s14, %s4900_s15  }
  0x21   :  { %4893 = dma.done.wait [#allocation3], 256  }
  0x22   :  { %4894 = vsyncadd [#allocation3], 4294967040 }
  0x23   :  { %4895 = dma.done.wait [#allocation5], 1024  }
  0x24   :  { %4896 = vsyncadd [#allocation5], 4294966272  ;;  %v4902_v0 = vmov 0.0   ;;  %vm4903_vm0 = vmmov 0   ;;  %vm86_vm1 = vcmask 261120   ;;  %v4972_v1 = vld [vmem:[#allocation2] sm:$0xff]  ;;  %v195_v19 = vlaneseq }
  0x25   :  { %4258 = vmatprep.subr.mxu0 %v4902_v0  ;;  %4266 = vmatprep.mubr.msk.f32.mxu0 %vm4903_vm0, %v4902_v0  ;;  %v4974_v2 = vld [vmem:[#allocation2 + $0x8] sm:$0xff]  ;;  %vm200_vm2 = vcmask 1041409   ;;  %v77_v5 = vld [vmem:[#allocation6 + $0x10] sm:$0xff]  ;;  %v76_v6 = vld [vmem:[#allocation6 + $0x8] sm:$0xff]  ;;  %s4904_s0 = smov 16   ;;  %vm205_vm4 = vcmask 130048  }
  0x26   :  { %v78_v3 = vld [vmem:[#allocation6 + $0x18] sm:$0xff]  ;;  %v199_v4 = vrot.slane %v4974_v2, 7  ;;  %4232 = vmatprep.mubr.msk.f32.mxu1 %vm86_vm1, %v4972_v1  ;;  %v75_v8 = vld [vmem:[#allocation6] sm:$0xff]  ;;  %v4993_v10 = vld [vmem:[%s5924_s1 + $0x40] sm:$0xff]  ;;  %v5058_v20 = vand.u32 127, %v195_v19  ;;  %vm207_vm5 = vcmask 392192  }
  0x27   :  { %4224 = vmatprep.subr.mxu1 %v78_v3  ;;  %v4985_v9 = vld [vmem:[%s5924_s1 + $0x48] sm:$0xff]  ;;  %v5002_v11 = vld [vmem:[%s5924_s1 + $0x38] sm:$0xff]  ;;  %v5009_v12 = vld [vmem:[%s5924_s1 + $0x30] sm:$0xff]  ;;  %vm215_vm6 = vcmask 654336   ;;  %s4905_s25 = smov 64   ;;  %v400_v56 = vshrl.u32 %v195_v19, 7 }
  0x28   :  { %4225 = vmatpush3.msra.mxu1 %v78_v3  ;;  %v201_v7 = vsel %vm200_vm2, %v199_v4, %v4972_v1  ;;  %v5016_v13 = vld [vmem:[%s5924_s1 + $0x28] sm:$0xff]  ;;  %v5023_v14 = vld [vmem:[%s5924_s1 + $0x20] sm:$0xff]  ;;  %v5030_v15 = vld [vmem:[%s5924_s1 + $0x18] sm:$0xff]  ;;  %vm197_vm3 = vcmp.eq.s32.totalorder %v5058_v20, 0  ;;  %v4907_v53 = vmov 1966171168  }
  0x29   :  { %4226 = vmatprep.subr.mxu1 %v77_v5  ;;  %202 = vrot.lane.b32.xlu0 %v201_v7, %s4904_s0  ;;  %v5037_v16 = vld [vmem:[%s5924_s1 + $0x10] sm:$0xff]  ;;  %v5044_v17 = vld [vmem:[%s5924_s1 + $0x8] sm:$0xff]  ;;  %v5051_v18 = vld [vmem:[%s5924_s1] sm:$0xff]  ;;  %v198_v21 = vsel %vm197_vm3, 1.0, %v4902_v0  ;;  %v397_v54 = vunpack.c.l.s4 %v4907_v53  ;;  %vm568_vm7 = vcmask 57344   ;;  %vm591_vm8 = vcmask 64512  }
  0x2a   :  { %4227 = vmatpush3.msra.mxu1 %v77_v5  ;;  %v3954_v25 = vld [vmem:[%s5929_s6] ss:$0 sm:$0xff]  ;;  %s4906_s6 = smov 32   ;;  %v5083_v43 = vld [vmem:[#allocation4 + $0x18] sm:$0xff]  ;;  %v5089_v45 = vld [vmem:[#allocation4 + $0x8] sm:$0xff]  ;;  %s4908_s23 = smov 80  }
  0x2b   :  { %4228 = vmatprep.subr.mxu1 %v76_v6  ;;  %v5075_v29 = vld [vmem:[%s5925_s2] ss:$0 sm:$0xff]  ;;  %4259 = vmatpush3.msra.mxu0 %v5083_v43  ;;  %v5093_v46 = vld [vmem:[#allocation4] sm:$0xff]  ;;  %v398_v55 = vunpack.c.0.s8 %v397_v54  ;;  %v5199_v53 = vld [vmem:[%s5930_s7 + $0x18] sm:$0xff]  ;;  %vm753_vm9 = vcmask 523264   ;;  %vm827_vm10 = vcmask 123904  }
  0x2c   :  { %4229 = vmatpush3.msra.mxu1 %v76_v6  ;;  %v5085_v44 = vld [vmem:[#allocation4 + $0x10] sm:$0xff]  ;;  %4260 = vmatprep.subr.mxu0 %v4902_v0  ;;  %v5206_v54 = vld [vmem:[%s5930_s7 + $0x10] sm:$0xff] }
  0x2d   :  { %4230 = vmatprep.subr.mxu1 %v75_v8  ;;  %4261 = vmatpush3.msra.mxu0 %v5085_v44  ;;  %v5119_v57 = vld [vmem:[%s5927_s4] ss:$0 sm:$0xff]  ;;  %v5121_v59 = vsub.s32 %v398_v55, %v400_v56  ;;  %v5213_v55 = vld [vmem:[%s5930_s7 + $0x8] sm:$0xff] }
  0x2e   :  { %4231 = vmatpush3.msra.mxu1 %v75_v8  ;;  %4262 = vmatprep.subr.mxu0 %v4902_v0  ;;  %v5222_v56 = vld [vmem:[%s5930_s7] sm:$0xff] }
  0x2f   :  { %4233 = vmatmul.mubr.msk.f32.vlgmr.msra.gmra.mxu1 %vm86_vm1, %v4974_v2  ;;  %4235 = vmatprep.subr.mxu1 %v4902_v0 }
  0x30   :  { %4236 = vmatpush3.msra.mxu1 %v4985_v9  ;;  %4255 = vmatprep.mubr.msk.f32.mxu1 %vm4903_vm0, %v4902_v0 }
  0x31   :  { %4237 = vmatprep.subr.mxu1 %v4902_v0  ;;  %4263 = vmatpush3.msra.mxu0 %v5089_v45 }
  0x32   :  { %4238 = vmatpush3.msra.mxu1 %v4993_v10  ;;  %4264 = vmatprep.subr.mxu0 %v4902_v0 }
  0x33   :  { %4239 = vmatprep.subr.mxu1 %v4902_v0  ;;  %4265 = vmatpush3.msra.mxu0 %v5093_v46 }
  0x34   :  { %4240 = vmatpush3.msra.mxu1 %v5002_v11  ;;  %4269 = vmatprep.subr.mxu0 %v4902_v0 }
  0x35   :  { %4241 = vmatprep.subr.mxu1 %v4902_v0 }
  0x36   :  { %4242 = vmatpush3.msra.mxu1 %v5009_v12 }
  0x37   :  { %4243 = vmatprep.subr.mxu1 %v4902_v0 }
  0x38   :  { %4244 = vmatpush3.msra.mxu1 %v5016_v13 }
  0x39   :  { %4245 = vmatprep.subr.mxu1 %v4902_v0 }
  0x3a   :  { %4246 = vmatpush3.msra.mxu1 %v5023_v14 }
  0x3b   :  { %4247 = vmatprep.subr.mxu1 %v4902_v0 }
  0x3c   :  { %4248 = vmatpush3.msra.mxu1 %v5030_v15 }
  0x3d   :  { %4249 = vmatprep.subr.mxu1 %v4902_v0 }
  0x3e   :  { %4250 = vmatpush3.msra.mxu1 %v5037_v16 }
  0x3f   :  { %4251 = vmatprep.subr.mxu1 %v4902_v0 }
  0x40   :  { %4252 = vmatpush3.msra.mxu1 %v5044_v17 }
  0x41   :  { %4253 = vmatprep.subr.mxu1 %v4902_v0 }
  0x42   :  { %4254 = vmatpush3.msra.mxu1 %v5051_v18 }
  0x43   :  { %4279 = vmatprep.subr.mxu1 %v4902_v0 }
  0x9b   :  { %v203_v22 = vpop.permute.xlu0 %202 }
  0x9c   :  { %v206_v23 = vsel %vm205_vm4, %v198_v21, %v203_v22 }
  0x9d   :  { %v208_v24 = vsel %vm207_vm5, %v206_v23, 0.0 }
  0x9e   :  { %4256 = vmatmul.mubr.msk.f32.vlgmr.msra.gmra.mxu1 %vm215_vm6, %v208_v24 }
  0x9f   :  { %4280 = vmatpush3.msra.mxu1 %v4972_v1  ;;  %4281 = vmatprep.mubr.msk.f32.mxu1 %vm4903_vm0, %v4902_v0 }
  0xa0   :  { %4289 = vmatprep.subr.mxu1 %v4902_v0 }
  0xef   :  { %v4234_v26 = vpop.f32.mrf.mxu1 }
  0xf0   :  { %v165_v27 = vadd.f32 %v4234_v26, %v3954_v25 }
  0xf1   :  { %v159_v28 = vpop.f32.mrf.mxu1 }
  0xf2   :  { %v160_v50 = vadd.f32 %v3954_v25, %v159_v28  ;;  %v5126_v5 = vmax.f32 %v165_v27, 0.0 }
  0xf4   :  { %v5104_v51 = vmax.f32 %v160_v50, 0.0  ;;  %v5192_v50 = vld [vmem:[%s5930_s7 + $0x20] sm:$0xff] }
 0x15e   :  { %v285_v30 = vpop.f32.mrf.mxu1 }
 0x15f   :  { %v286_v31 = vadd.f32 %v5075_v29, %v285_v30 }
 0x160   :  { %v4257_v32 = vpop.f32.mrf.mxu1 }
 0x161   :  { %4686 = vtanh.f32 %v286_v31  ;;  %v3959_v34 = vmul.f32 -1.442695, %v286_v31 }
 0x163   :  { %4688 = vpow2.f32 %v3959_v34 }
 0x16e   :  { %v4687_v33 = vpop.eup %4686 }
 0x16f   :  { %298 = vrot.lane.b32.xlu0 %v4687_v33, %s4905_s25 }
 0x170   :  { %v4689_v35 = vpop.eup %4688 }
 0x171   :  { %v292_v36 = vadd.f32 1.0, %v4689_v35 }
 0x173   :  { %4690 = vrcp.f32 %v292_v36 }
 0x180   :  { %v4691_v37 = vpop.eup %4690 }
 0x181   :  { %v296_v40 = vmul.f32 0.0, %v4691_v37 }
 0x1e1   :  { %v299_v38 = vpop.permute.xlu0 %298 }
 0x1e2   :  { %v301_v39 = vmul.f32 %v4691_v37, %v299_v38 }
 0x1e4   :  { %303 = vrot.lane.b32.xlu1 %v301_v39, %s4906_s6 }
 0x256   :  { %v304_v41 = vpop.permute.xlu1 %303 }
 0x257   :  { %v5080_v42 = vadd.f32 %v304_v41, %v296_v40  ;;  %v5173_v41 = vld [vmem:[%s5930_s7 + $0x38] sm:$0xff] }
 0x259   :  { %4692 = vtanh.f32 %v5080_v42 }
 0x266   :  { %v4693_v47 = vpop.eup %4692 }
 0x267   :  { %309 = vrot.lane.b32.xlu1 %v4693_v47, %s4905_s25  ;;  %v5178_v47 = vld [vmem:[%s5930_s7 + $0x30] sm:$0xff] }
 0x2d9   :  { %v310_v48 = vpop.permute.xlu1 %309 }
 0x2da   :  { %v5100_v49 = vmul.f32 %v4691_v37, %v310_v48  ;;  %v5185_v48 = vld [vmem:[%s5930_s7 + $0x28] sm:$0xff] }
 0x2dc   :  { %320 = vrot.lane.b32.xlu0 %v5100_v49, %s4906_s6 }
 0x34e   :  { %v5106_v52 = vpop.permute.xlu0 %320 }
 0x34f   :  { %4267 = vmatmul.mubr.msk.f32.vlgmr.msra.gmra.mxu0 %vm86_vm1, %v5106_v52 }
 0x350   :  { %4270 = vmatpush3.xpose.msk.msra.mxu0 %vm86_vm1, %v5104_v51  ;;  %4271 = vmatprep.mubr.msk.f32.mxu0 %vm4903_vm0, %v4902_v0 }
 0x351   :  { %4274 = vmatprep.subr.mxu0 %v4902_v0 }
 0x40f   :  { %v390_v58 = vpop.f32.mrf.mxu0 }
 0x410   :  { %v391_v60 = vadd.f32 %v5119_v57, %v390_v58 }
 0x411   :  { %v4268_v61 = vpop.f32.mrf.mxu0 }
 0x412   :  { %v394_v62 = vmax.f32 %v391_v60, 0.0 }
 0x414   :  { %v402_v63 = vrot.slane %v394_v62, %v5121_v59 }
 0x416   :  { %v403_v3 = vcombine.high %v402_v63, %v402_v63  ;;  %v410_v4 = vrot.slane %v402_v63, %v5121_v59 }
 0x418   :  { %4272 = vmatmul.mubr.msk.f32.vlgmr.msra.gmra.mxu0 %vm86_vm1, %v410_v4  ;;  %v417_v6 = vrot.slane %v403_v3, %v5121_v59 }
 0x419   :  { %4275 = vmatpush3.xpose.msk.msra.mxu0 %vm86_vm1, %v5126_v5  ;;  %4276 = vmatprep.mubr.msk.f32.mxu0 %vm4903_vm0, %v4902_v0 }
 0x41a   :  { %4284 = vmatprep.subr.mxu0 %v4902_v0 }
 0x41c   :  { %4277 = vmatmul.mubr.msk.f32.vlgmr.msra.gmra.mxu0 %vm86_vm1, %v417_v6 }
 0x41d   :  { %4285 = vmatpush3.msra.mxu0 %v4974_v2  ;;  %4286 = vmatprep.mubr.msk.f32.mxu0 %vm4903_vm0, %v4902_v0 }
 0x41e   :  { %4308 = vmatprep.subr.mxu0 %v4902_v0 }
 0x4d8   :  { %v489_v7 = vpop.f32.mrf.mxu0 }
 0x4d9   :  { %v569_v8 = vsel %vm568_vm7, %v489_v7, -inf }
 0x4da   :  { %570 = vmax.xlane.f32.xlu0 %v569_v8  ;;  %v4273_v19 = vpop.f32.mrf.mxu0 }
 0x4dc   :  { %v564_v21 = vpop.f32.mrf.mxu0 }
 0x4dd   :  { %v572_v22 = vsel %vm568_vm7, %v564_v21, -inf }
 0x4de   :  { %573 = vmax.xlane.f32.xlu1 %v572_v22  ;;  %v4278_v23 = vpop.f32.mrf.mxu0 }
 0x563   :  { %v571_v24 = vpop.xlane.xlu0 %570 }
 0x564   :  { %v575_v25 = vsub.f32 %v489_v7, %v571_v24 }
 0x566   :  { %v577_v26 = vmul.f32 1.442695, %v575_v25 }
 0x567   :  { %v574_v27 = vpop.xlane.xlu1 %573 }
 0x568   :  { %4694 = vpow2.f32 %v577_v26  ;;  %v576_v28 = vsub.f32 %v564_v21, %v574_v27 }
 0x56a   :  { %v579_v30 = vmul.f32 1.442695, %v576_v28 }
 0x56c   :  { %4696 = vpow2.f32 %v579_v30 }
 0x575   :  { %v4695_v31 = vpop.eup %4694 }
 0x576   :  { %v581_v32 = vsel %vm568_vm7, %v4695_v31, 0.0 }
 0x577   :  { %582 = vadd.xlane.f32.xlu1 %v581_v32 }
 0x579   :  { %v4697_v33 = vpop.eup %4696 }
 0x57a   :  { %v584_v34 = vsel %vm568_vm7, %v4697_v33, 0.0 }
 0x57b   :  { %585 = vadd.xlane.f32.xlu0 %v584_v34 }
 0x600   :  { %v583_v35 = vpop.xlane.xlu1 %582 }
 0x601   :  { %4698 = vrcp.f32 %v583_v35 }
 0x604   :  { %v586_v36 = vpop.xlane.xlu0 %585 }
 0x605   :  { %4700 = vrcp.f32 %v586_v36 }
 0x60e   :  { %v4699_v37 = vpop.eup %4698 }
 0x60f   :  { %v589_v38 = vmul.f32 %v4699_v37, %v4695_v31 }
 0x611   :  { %4282 = vmatmul.mubr.msk.f32.vlgmr.msra.gmra.mxu1 %vm591_vm8, %v589_v38 }
 0x612   :  { %v4701_v39 = vpop.eup %4700  ;;  %4305 = vmatprep.mubr.msk.f32.mxu1 %vm4903_vm0, %v4902_v0  ;;  %4290 = vmatpush3.msra.mxu1 %v5173_v41 }
 0x613   :  { %v590_v40 = vmul.f32 %v4701_v39, %v4697_v33  ;;  %4291 = vmatprep.subr.mxu1 %v4902_v0 }
 0x614   :  { %4292 = vmatpush3.msra.mxu1 %v5178_v47 }
 0x615   :  { %4287 = vmatmul.mubr.msk.f32.vlgmr.msra.gmra.mxu0 %vm591_vm8, %v590_v40  ;;  %4293 = vmatprep.subr.mxu1 %v4902_v0 }
 0x616   :  { %4309 = vmatpush3.msra.mxu0 %v4985_v9  ;;  %4328 = vmatprep.mubr.msk.f32.mxu0 %vm4903_vm0, %v4902_v0 }
 0x617   :  { %4310 = vmatprep.subr.mxu0 %v4902_v0  ;;  %4294 = vmatpush3.msra.mxu1 %v5185_v48 }
 0x618   :  { %4311 = vmatpush3.msra.mxu0 %v4993_v10  ;;  %4295 = vmatprep.subr.mxu1 %v4902_v0 }
 0x619   :  { %4312 = vmatprep.subr.mxu0 %v4902_v0  ;;  %4296 = vmatpush3.msra.mxu1 %v5192_v50 }
 0x61a   :  { %4313 = vmatpush3.msra.mxu0 %v5002_v11  ;;  %4297 = vmatprep.subr.mxu1 %v4902_v0 }
 0x61b   :  { %4314 = vmatprep.subr.mxu0 %v4902_v0  ;;  %4298 = vmatpush3.msra.mxu1 %v5199_v53 }
 0x61c   :  { %4315 = vmatpush3.msra.mxu0 %v5009_v12  ;;  %4299 = vmatprep.subr.mxu1 %v4902_v0 }
 0x61d   :  { %4316 = vmatprep.subr.mxu0 %v4902_v0  ;;  %4300 = vmatpush3.msra.mxu1 %v5206_v54 }
 0x61e   :  { %4317 = vmatpush3.msra.mxu0 %v5016_v13  ;;  %4301 = vmatprep.subr.mxu1 %v4902_v0 }
 0x61f   :  { %4318 = vmatprep.subr.mxu0 %v4902_v0  ;;  %4302 = vmatpush3.msra.mxu1 %v5213_v55 }
 0x620   :  { %4319 = vmatpush3.msra.mxu0 %v5023_v14  ;;  %4303 = vmatprep.subr.mxu1 %v4902_v0 }
 0x621   :  { %4320 = vmatprep.subr.mxu0 %v4902_v0  ;;  %4304 = vmatpush3.msra.mxu1 %v5222_v56 }
 0x622   :  { %4321 = vmatpush3.msra.mxu0 %v5030_v15  ;;  %4331 = vmatprep.subr.mxu1 %v4902_v0 }
 0x623   :  { %4322 = vmatprep.subr.mxu0 %v4902_v0 }
 0x624   :  { %4323 = vmatpush3.msra.mxu0 %v5037_v16 }
 0x625   :  { %4324 = vmatprep.subr.mxu0 %v4902_v0 }
 0x626   :  { %4325 = vmatpush3.msra.mxu0 %v5044_v17 }
 0x627   :  { %4326 = vmatprep.subr.mxu0 %v4902_v0 }
 0x628   :  { %4327 = vmatpush3.msra.mxu0 %v5051_v18 }
 0x629   :  { %4342 = vmatprep.subr.mxu0 %v4902_v0 }
 0x6d1   :  { %v661_v58 = vpop.f32.mrf.mxu1 }
 0x6d3   :  { %v4283_v60 = vpop.f32.mrf.mxu1 }
 0x6d5   :  { %v734_v61 = vpop.f32.mrf.mxu0 }
 0x6d6   :  { %v741_v62 = vrot.slane %v734_v61, 7 }
 0x6d7   :  { %v4288_v63 = vpop.f32.mrf.mxu0 }
 0x6d8   :  { %v742_v3 = vsel %vm200_vm2, %v741_v62, %v661_v58 }
 0x6d9   :  { %743 = vrot.lane.b32.xlu0 %v742_v3, %s4906_s6 }
 0x6dd   :  { %849 = vrot.lane.b32.xlu0 %v5100_v49, %s4908_s23  ;;  %v5246_v49 = vld [vmem:[%s5931_s8] ss:$0 sm:$0xff] }
 0x74b   :  { %v744_v4 = vpop.permute.xlu0 %743 }
 0x74c   :  { %v746_v6 = vsel %vm86_vm1, %v5106_v52, %v744_v4 }
 0x74d   :  { %4306 = vmatmul.mubr.msk.f32.vlgmr.msra.gmra.mxu1 %vm753_vm9, %v746_v6 }
 0x74e   :  { %4332 = vmatpush3.msra.mxu1 %v5083_v43  ;;  %4339 = vmatprep.mubr.msk.f32.mxu1 %vm4903_vm0, %v4902_v0 }
 0x74f   :  { %4333 = vmatprep.subr.mxu1 %v4902_v0  ;;  %v850_v36 = vpop.permute.xlu0 %849 }
 0x750   :  { %4334 = vmatpush3.msra.mxu1 %v5085_v44 }
 0x751   :  { %4335 = vmatprep.subr.mxu1 %v4902_v0 }
 0x752   :  { %4336 = vmatpush3.msra.mxu1 %v5089_v45 }
 0x753   :  { %4337 = vmatprep.subr.mxu1 %v4902_v0 }
 0x754   :  { %4338 = vmatpush3.msra.mxu1 %v5093_v46 }
 0x755   :  { %4347 = vmatprep.subr.mxu1 %v4902_v0 }
 0x80d   :  { %v823_v52 = vpop.f32.mrf.mxu1 }
 0x80e   :  { %v824_v7 = vadd.f32 %v5246_v49, %v823_v52 }
 0x80f   :  { %v4307_v8 = vpop.f32.mrf.mxu1 }
 0x810   :  { %v828_v19 = vsel %vm827_vm10, %v824_v7, -inf }
 0x811   :  { %829 = vmax.xlane.f32.xlu1 %v828_v19 }
 0x89a   :  { %v830_v21 = vpop.xlane.xlu1 %829 }
 0x89b   :  { %v831_v22 = vsub.f32 %v824_v7, %v830_v21 }
 0x89d   :  { %v832_v23 = vmul.f32 1.442695, %v831_v22 }
 0x89f   :  { %4702 = vpow2.f32 %v832_v23 }
 0x8ac   :  { %v4703_v24 = vpop.eup %4702 }
 0x8ad   :  { %v834_v25 = vsel %vm827_vm10, %v4703_v24, 0.0 }
 0x8ae   :  { %835 = vadd.xlane.f32.xlu1 %v834_v25 }
 0x937   :  { %v836_v26 = vpop.xlane.xlu1 %835 }
 0x938   :  { %4704 = vlog2.f32 %v836_v26 }
 0x945   :  { %v4705_v27 = vpop.eup %4704 }
 0x946   :  { %v838_v28 = vmul.f32 0.6931472, %v4705_v27 }
 0x948   :  { %v839_v30 = vadd.f32 %v838_v28, %v830_v21 }
 0x94a   :  { %v5251_v31 = vsub.f32 %v824_v7, %v839_v30 }
 0x94c   :  { %v841_v32 = vsel %vm827_vm10, %v5251_v31, -inf }
 0x94d   :  { %842 = vmax.index.xlane.f32.xlu1 %v841_v32 }
 0x95e   :  { %846 = vrot.lane.b32.xlu1 %v742_v3, %s4904_s0 }
 0x9d6   :  { %v843_v33 = vpop.xlane.xlu1 %842 }
 0x9d7   :  { %vm844_vm11 = vcmp.eq.s32.totalorder %v5058_v20, %v843_v33 }
 0x9d8   :  { %v845_v34 = vsel %vm844_vm11, 1.0, %v4902_v0 }
 0x9da   :  { %v847_v35 = vpop.permute.xlu1 %846 }
 0x9db   :  { %v852_v37 = vsel %vm205_vm4, %v845_v34, %v847_v35 }
 0x9dc   :  { %v853_v38 = vsel %vm207_vm5, %v852_v37, %v850_v36 }
 0x9dd   :  { %4329 = vmatmul.mubr.msk.f32.vlgmr.msra.gmra.mxu0 %vm215_vm6, %v853_v38 }
 0x9de   :  { %4343 = vmatpush3.xpose.msk.msra.mxu0 %vm86_vm1, %v5104_v51  ;;  %4344 = vmatprep.mubr.msk.f32.mxu0 %vm4903_vm0, %v4902_v0 }
 0x9df   :  { %4352 = vmatprep.subr.mxu0 %v4902_v0 }
 0xa9d   :  { %v923_v39 = vpop.f32.mrf.mxu0 }
 0xa9e   :  { %v924_v40 = vadd.f32 %v5075_v29, %v923_v39 }
 0xa9f   :  { %v4330_v58 = vpop.f32.mrf.mxu0 }
 0xaa0   :  { %4706 = vtanh.f32 %v924_v40  ;;  %v3971_v61 = vmul.f32 -1.442695, %v924_v40 }
 0xaa2   :  { %4708 = vpow2.f32 %v3971_v61 }
 0xaad   :  { %v4707_v60 = vpop.eup %4706 }
 0xaae   :  { %936 = vrot.lane.b32.xlu0 %v4707_v60, %s4905_s25 }
 0xaaf   :  { %v4709_v62 = vpop.eup %4708 }
 0xab0   :  { %v930_v63 = vadd.f32 1.0, %v4709_v62 }
 0xab2   :  { %4710 = vrcp.f32 %v930_v63 }
 0xabf   :  { %v4711_v3 = vpop.eup %4710 }
 0xac0   :  { %v934_v52 = vmul.f32 %v4711_v3, %v5080_v42 }
 0xb20   :  { %v937_v4 = vpop.permute.xlu0 %936 }
 0xb21   :  { %v939_v6 = vmul.f32 %v4711_v3, %v937_v4 }
 0xb23   :  { %941 = vrot.lane.b32.xlu0 %v939_v6, %s4906_s6 }
 0xb95   :  { %v942_v7 = vpop.permute.xlu0 %941 }
 0xb96   :  { %v5270_v8 = vadd.f32 %v942_v7, %v934_v52 }
 0xb98   :  { %4712 = vtanh.f32 %v5270_v8 }
 0xba5   :  { %v4713_v19 = vpop.eup %4712 }
 0xba6   :  { %947 = vrot.lane.b32.xlu1 %v4713_v19, %s4905_s25 }
 0xc18   :  { %v948_v21 = vpop.permute.xlu1 %947 }
 0xc19   :  { %v5274_v22 = vmul.f32 %v4711_v3, %v948_v21 }
 0xc1b   :  { %952 = vrot.lane.b32.xlu0 %v5274_v22, %s4906_s6 }
 0xc8d   :  { %v5278_v23 = vpop.permute.xlu0 %952 }
 0xc8e   :  { %4340 = vmatmul.mubr.msk.f32.vlgmr.msra.gmra.mxu1 %vm86_vm1, %v5278_v23 }
 0xc8f   :  { %4348 = vmatpush3.xpose.msk.msra.mxu1 %vm86_vm1, %v5126_v5  ;;  %4349 = vmatprep.mubr.msk.f32.mxu1 %vm4903_vm0, %v4902_v0 }
 0xc90   :  { %4357 = vmatprep.subr.mxu1 %v4902_v0 }
 0xd4e   :  { %v1022_v42 = vpop.f32.mrf.mxu1 }
 0xd4f   :  { %v1023_v24 = vadd.f32 %v5119_v57, %v1022_v42 }
 0xd50   :  { %v4341_v25 = vpop.f32.mrf.mxu1 }
 0xd51   :  { %v1026_v26 = vmax.f32 %v1023_v24, 0.0 }
 0xd53   :  { %v1034_v27 = vrot.slane %v1026_v26, %v5121_v59 }
 0xd55   :  { %v1035_v28 = vcombine.high %v1034_v27, %v1034_v27  ;;  %v1042_v30 = vrot.slane %v1034_v27, %v5121_v59 }
 0xd57   :  { %v1049_v32 = vrot.slane %v1035_v28, %v5121_v59  ;;  %4345 = vmatmul.mubr.msk.f32.vlgmr.msra.gmra.mxu0 %vm86_vm1, %v1042_v30 }
 0xd58   :  { %4353 = vmatpush3.msra.mxu0 %v4972_v1  ;;  %4354 = vmatprep.mubr.msk.f32.mxu0 %vm4903_vm0, %v4902_v0 }
 0xd59   :  { %4350 = vmatmul.mubr.msk.f32.vlgmr.msra.gmra.mxu1 %vm86_vm1, %v1049_v32  ;;  %4362 = vmatprep.subr.mxu0 %v4902_v0 }
 0xd5a   :  { %4358 = vmatpush3.msra.mxu1 %v4974_v2  ;;  %4359 = vmatprep.mubr.msk.f32.mxu1 %vm4903_vm0, %v4902_v0 }
 0xd5b   :  { %4381 = vmatprep.subr.mxu1 %v4902_v0 }
 0xe17   :  { %v1118_v33 = vpop.f32.mrf.mxu0 }
 0xe18   :  { %v1194_v34 = vsel %vm568_vm7, %v1118_v33, -inf }
 0xe19   :  { %v1190_v35 = vpop.f32.mrf.mxu1  ;;  %1195 = vmax.xlane.f32.xlu0 %v1194_v34  ;;  %v4346_v36 = vpop.f32.mrf.mxu0 }
 0xe1a   :  { %v1197_v37 = vsel %vm568_vm7, %v1190_v35, -inf }
 0xe1b   :  { %1198 = vmax.xlane.f32.xlu1 %v1197_v37  ;;  %v4351_v38 = vpop.f32.mrf.mxu1 }
 0xea2   :  { %v1196_v39 = vpop.xlane.xlu0 %1195 }
 0xea3   :  { %v1200_v40 = vsub.f32 %v1118_v33, %v1196_v39 }
 0xea4   :  { %v1199_v58 = vpop.xlane.xlu1 %1198 }
 0xea5   :  { %v1202_v60 = vmul.f32 1.442695, %v1200_v40  ;;  %v1201_v61 = vsub.f32 %v1190_v35, %v1199_v58 }
 0xea7   :  { %4714 = vpow2.f32 %v1202_v60  ;;  %v1204_v62 = vmul.f32 1.442695, %v1201_v61 }
 0xea9   :  { %4716 = vpow2.f32 %v1204_v62 }
 0xeb4   :  { %v4715_v63 = vpop.eup %4714 }
 0xeb5   :  { %v1206_v3 = vsel %vm568_vm7, %v4715_v63, 0.0 }
 0xeb6   :  { %v4717_v4 = vpop.eup %4716  ;;  %1207 = vadd.xlane.f32.xlu1 %v1206_v3 }
 0xeb7   :  { %v1209_v6 = vsel %vm568_vm7, %v4717_v4, 0.0 }
 0xeb8   :  { %1210 = vadd.xlane.f32.xlu0 %v1209_v6 }
 0xf3f   :  { %v1208_v52 = vpop.xlane.xlu1 %1207 }
 0xf40   :  { %4718 = vrcp.f32 %v1208_v52 }
 0xf41   :  { %v1211_v7 = vpop.xlane.xlu0 %1210 }
 0xf42   :  { %4720 = vrcp.f32 %v1211_v7 }
 0xf4d   :  { %v4719_v19 = vpop.eup %4718 }
 0xf4e   :  { %v1214_v21 = vmul.f32 %v4719_v19, %v4715_v63 }
 0xf4f   :  { %v4721_v42 = vpop.eup %4720 }
 0xf50   :  { %4355 = vmatmul.mubr.msk.f32.vlgmr.msra.gmra.mxu0 %vm591_vm8, %v1214_v21  ;;  %v1215_v24 = vmul.f32 %v4721_v42, %v4717_v4 }
 0xf51   :  { %4363 = vmatpush3.msra.mxu0 %v5173_v41  ;;  %4378 = vmatprep.mubr.msk.f32.mxu0 %vm4903_vm0, %v4902_v0 }
 0xf52   :  { %4360 = vmatmul.mubr.msk.f32.vlgmr.msra.gmra.mxu1 %vm591_vm8, %v1215_v24  ;;  %4364 = vmatprep.subr.mxu0 %v4902_v0 }
 0xf53   :  { %4365 = vmatpush3.msra.mxu0 %v5178_v47  ;;  %4382 = vmatpush3.msra.mxu1 %v4985_v9 }
 0xf54   :  { %4366 = vmatprep.subr.mxu0 %v4902_v0  ;;  %4383 = vmatprep.subr.mxu1 %v4902_v0 }
 0xf55   :  { %4367 = vmatpush3.msra.mxu0 %v5185_v48  ;;  %4384 = vmatpush3.msra.mxu1 %v4993_v10 }
 0xf56   :  { %4368 = vmatprep.subr.mxu0 %v4902_v0  ;;  %4385 = vmatprep.subr.mxu1 %v4902_v0 }
 0xf57   :  { %4369 = vmatpush3.msra.mxu0 %v5192_v50  ;;  %4386 = vmatpush3.msra.mxu1 %v5002_v11 }
 0xf58   :  { %4370 = vmatprep.subr.mxu0 %v4902_v0  ;;  %4387 = vmatprep.subr.mxu1 %v4902_v0 }
 0xf59   :  { %4371 = vmatpush3.msra.mxu0 %v5199_v53  ;;  %4388 = vmatpush3.msra.mxu1 %v5009_v12 }
 0xf5a   :  { %4372 = vmatprep.subr.mxu0 %v4902_v0  ;;  %4389 = vmatprep.subr.mxu1 %v4902_v0 }
 0xf5b   :  { %4373 = vmatpush3.msra.mxu0 %v5206_v54  ;;  %4390 = vmatpush3.msra.mxu1 %v5016_v13 }
 0xf5c   :  { %4374 = vmatprep.subr.mxu0 %v4902_v0  ;;  %4391 = vmatprep.subr.mxu1 %v4902_v0 }
 0xf5d   :  { %4375 = vmatpush3.msra.mxu0 %v5213_v55  ;;  %4392 = vmatpush3.msra.mxu1 %v5023_v14 }
 0xf5e   :  { %4376 = vmatprep.subr.mxu0 %v4902_v0  ;;  %4393 = vmatprep.subr.mxu1 %v4902_v0 }
 0xf5f   :  { %4377 = vmatpush3.msra.mxu0 %v5222_v56  ;;  %4394 = vmatpush3.msra.mxu1 %v5030_v15 }
 0xf60   :  { %4395 = vmatprep.subr.mxu1 %v4902_v0  ;;  %4401 = vmatprep.mubr.msk.f32.mxu1 %vm4903_vm0, %v4902_v0 }
 0xf61   :  { %4396 = vmatpush3.msra.mxu1 %v5037_v16  ;;  %4404 = vmatprep.subr.mxu0 %v4902_v0 }
 0xf62   :  { %4397 = vmatprep.subr.mxu1 %v4902_v0 }
 0xf63   :  { %4398 = vmatpush3.msra.mxu1 %v5044_v17 }
 0xf64   :  { %4399 = vmatprep.subr.mxu1 %v4902_v0 }
 0xf65   :  { %4400 = vmatpush3.msra.mxu1 %v5051_v18 }
 0xf66   :  { %4415 = vmatprep.subr.mxu1 %v4902_v0 }
0x1010   :  { %v1285_v25 = vpop.f32.mrf.mxu0 }
0x1012   :  { %v4356_v26 = vpop.f32.mrf.mxu0  ;;  %v1358_v27 = vpop.f32.mrf.mxu1 }
0x1013   :  { %v1365_v28 = vrot.slane %v1358_v27, 7 }
0x1014   :  { %v4361_v30 = vpop.f32.mrf.mxu1 }
0x1015   :  { %v1366_v32 = vsel %vm200_vm2, %v1365_v28, %v1285_v25 }
0x1016   :  { %1367 = vrot.lane.b32.xlu0 %v1366_v32, %s4906_s6 }
0x101a   :  { %1465 = vrot.lane.b32.xlu0 %v5274_v22, %s4908_s23 }
0x1088   :  { %v1368_v33 = vpop.permute.xlu0 %1367 }
0x1089   :  { %v1370_v34 = vsel %vm86_vm1, %v5278_v23, %v1368_v33 }
0x108a   :  { %4379 = vmatmul.mubr.msk.f32.vlgmr.msra.gmra.mxu0 %vm753_vm9, %v1370_v34 }
0x108b   :  { %4405 = vmatpush3.msra.mxu0 %v5083_v43  ;;  %4412 = vmatprep.mubr.msk.f32.mxu0 %vm4903_vm0, %v4902_v0 }
0x108c   :  { %4406 = vmatprep.subr.mxu0 %v4902_v0  ;;  %v1466_v19 = vpop.permute.xlu0 %1465 }
0x108d   :  { %4407 = vmatpush3.msra.mxu0 %v5085_v44 }
0x108e   :  { %4408 = vmatprep.subr.mxu0 %v4902_v0 }
0x108f   :  { %4409 = vmatpush3.msra.mxu0 %v5089_v45 }
0x1090   :  { %4410 = vmatprep.subr.mxu0 %v4902_v0 }
0x1091   :  { %4411 = vmatpush3.msra.mxu0 %v5093_v46 }
0x1092   :  { %4420 = vmatprep.subr.mxu0 %v4902_v0 }
0x114a   :  { %v1440_v22 = vpop.f32.mrf.mxu0 }
0x114b   :  { %v1441_v23 = vadd.f32 %v5246_v49, %v1440_v22 }
0x114c   :  { %v4380_v35 = vpop.f32.mrf.mxu0 }
0x114d   :  { %v1444_v36 = vsel %vm827_vm10, %v1441_v23, -inf }
0x114e   :  { %1445 = vmax.xlane.f32.xlu1 %v1444_v36 }
0x11d7   :  { %v1446_v37 = vpop.xlane.xlu1 %1445 }
0x11d8   :  { %v1447_v38 = vsub.f32 %v1441_v23, %v1446_v37 }
0x11da   :  { %v1448_v39 = vmul.f32 1.442695, %v1447_v38 }
0x11dc   :  { %4722 = vpow2.f32 %v1448_v39 }
0x11e9   :  { %v4723_v40 = vpop.eup %4722 }
0x11ea   :  { %v1450_v58 = vsel %vm827_vm10, %v4723_v40, 0.0 }
0x11eb   :  { %1451 = vadd.xlane.f32.xlu1 %v1450_v58 }
0x1274   :  { %v1452_v60 = vpop.xlane.xlu1 %1451 }
0x1275   :  { %4724 = vlog2.f32 %v1452_v60 }
0x1282   :  { %v4725_v61 = vpop.eup %4724 }
0x1283   :  { %v1454_v62 = vmul.f32 0.6931472, %v4725_v61 }
0x1285   :  { %v1455_v63 = vadd.f32 %v1454_v62, %v1446_v37 }
0x1287   :  { %v5367_v3 = vsub.f32 %v1441_v23, %v1455_v63 }
0x1289   :  { %v1457_v4 = vsel %vm827_vm10, %v5367_v3, -inf }
0x128a   :  { %1458 = vmax.index.xlane.f32.xlu1 %v1457_v4 }
0x129b   :  { %1462 = vrot.lane.b32.xlu1 %v1366_v32, %s4904_s0 }
0x1313   :  { %v1459_v6 = vpop.xlane.xlu1 %1458 }
0x1314   :  { %vm1460_vm12 = vcmp.eq.s32.totalorder %v5058_v20, %v1459_v6 }
0x1315   :  { %v1461_v52 = vsel %vm1460_vm12, 1.0, %v4902_v0 }
0x1317   :  { %v1463_v7 = vpop.permute.xlu1 %1462 }
0x1318   :  { %v1468_v21 = vsel %vm205_vm4, %v1461_v52, %v1463_v7 }
0x1319   :  { %v1469_v42 = vsel %vm207_vm5, %v1468_v21, %v1466_v19 }
0x131a   :  { %4402 = vmatmul.mubr.msk.f32.vlgmr.msra.gmra.mxu1 %vm215_vm6, %v1469_v42 }
0x131b   :  { %4416 = vmatpush3.xpose.msk.msra.mxu1 %vm86_vm1, %v5104_v51  ;;  %4417 = vmatprep.mubr.msk.f32.mxu1 %vm4903_vm0, %v4902_v0 }
0x131c   :  { %4425 = vmatprep.subr.mxu1 %v4902_v0 }
0x13da   :  { %v1539_v24 = vpop.f32.mrf.mxu1 }
0x13db   :  { %v1540_v25 = vadd.f32 %v5075_v29, %v1539_v24 }
0x13dc   :  { %v4403_v26 = vpop.f32.mrf.mxu1 }
0x13dd   :  { %4726 = vtanh.f32 %v1540_v25  ;;  %v3981_v28 = vmul.f32 -1.442695, %v1540_v25 }
0x13df   :  { %4728 = vpow2.f32 %v3981_v28 }
0x13ea   :  { %v4727_v27 = vpop.eup %4726 }
0x13eb   :  { %1552 = vrot.lane.b32.xlu0 %v4727_v27, %s4905_s25 }
0x13ec   :  { %v4729_v30 = vpop.eup %4728 }
0x13ed   :  { %v1546_v32 = vadd.f32 1.0, %v4729_v30 }
0x13ef   :  { %4730 = vrcp.f32 %v1546_v32 }
0x13fc   :  { %v4731_v33 = vpop.eup %4730 }
0x13fd   :  { %v1550_v23 = vmul.f32 %v4731_v33, %v5270_v8 }
0x145d   :  { %v1553_v34 = vpop.permute.xlu0 %1552 }
0x145e   :  { %v1555_v22 = vmul.f32 %v4731_v33, %v1553_v34 }
0x1460   :  { %1557 = vrot.lane.b32.xlu0 %v1555_v22, %s4906_s6 }
0x14d2   :  { %v1558_v35 = vpop.permute.xlu0 %1557 }
0x14d3   :  { %v5386_v36 = vadd.f32 %v1558_v35, %v1550_v23 }
0x14d5   :  { %4732 = vtanh.f32 %v5386_v36 }
0x14e2   :  { %v4733_v29 = vpop.eup %4732 }
0x14e3   :  { %1563 = vrot.lane.b32.xlu1 %v4733_v29, %s4905_s25 }
0x1555   :  { %v1564_v37 = vpop.permute.xlu1 %1563 }
0x1556   :  { %v5390_v38 = vmul.f32 %v4731_v33, %v1564_v37 }
0x1558   :  { %1568 = vrot.lane.b32.xlu0 %v5390_v38, %s4906_s6 }
0x15ca   :  { %v5394_v39 = vpop.permute.xlu0 %1568 }
0x15cb   :  { %4413 = vmatmul.mubr.msk.f32.vlgmr.msra.gmra.mxu0 %vm86_vm1, %v5394_v39 }
0x15cc   :  { %4421 = vmatpush3.xpose.msk.msra.mxu0 %vm86_vm1, %v5126_v5  ;;  %4422 = vmatprep.mubr.msk.f32.mxu0 %vm4903_vm0, %v4902_v0 }
0x15cd   :  { %4430 = vmatprep.subr.mxu0 %v4902_v0 }
0x168b   :  { %v1638_v8 = vpop.f32.mrf.mxu0 }
0x168c   :  { %v1639_v40 = vadd.f32 %v5119_v57, %v1638_v8 }
0x168d   :  { %v4414_v58 = vpop.f32.mrf.mxu0 }
0x168e   :  { %v1642_v60 = vmax.f32 %v1639_v40, 0.0 }
0x1690   :  { %v1650_v61 = vrot.slane %v1642_v60, %v5121_v59 }
0x1692   :  { %v1651_v62 = vcombine.high %v1650_v61, %v1650_v61  ;;  %v1658_v63 = vrot.slane %v1650_v61, %v5121_v59 }
0x1694   :  { %v1665_v4 = vrot.slane %v1651_v62, %v5121_v59  ;;  %4418 = vmatmul.mubr.msk.f32.vlgmr.msra.gmra.mxu1 %vm86_vm1, %v1658_v63 }
0x1695   :  { %4426 = vmatpush3.msra.mxu1 %v4972_v1  ;;  %4427 = vmatprep.mubr.msk.f32.mxu1 %vm4903_vm0, %v4902_v0 }
0x1696   :  { %4423 = vmatmul.mubr.msk.f32.vlgmr.msra.gmra.mxu0 %vm86_vm1, %v1665_v4  ;;  %4435 = vmatprep.subr.mxu1 %v4902_v0 }
0x1697   :  { %4431 = vmatpush3.msra.mxu0 %v4974_v2  ;;  %4432 = vmatprep.mubr.msk.f32.mxu0 %vm4903_vm0, %v4902_v0 }
0x1698   :  { %4454 = vmatprep.subr.mxu0 %v4902_v0 }
0x1754   :  { %v1734_v57 = vpop.f32.mrf.mxu1 }
0x1755   :  { %v1810_v6 = vsel %vm568_vm7, %v1734_v57, -inf }
0x1756   :  { %1811 = vmax.xlane.f32.xlu0 %v1810_v6  ;;  %v4419_v52 = vpop.f32.mrf.mxu1  ;;  %v1806_v1 = vpop.f32.mrf.mxu0 }
0x1757   :  { %v1813_v7 = vsel %vm568_vm7, %v1806_v1, -inf }
0x1758   :  { %1814 = vmax.xlane.f32.xlu1 %v1813_v7  ;;  %v4424_v19 = vpop.f32.mrf.mxu0 }
0x1759   :  { %v5501_v19 = vld [vmem:[%s5925_s2] ss:$0 sm:$0xff] }
0x17df   :  { %v1812_v21 = vpop.xlane.xlu0 %1811 }
0x17e0   :  { %v1816_v42 = vsub.f32 %v1734_v57, %v1812_v21 }
0x17e1   :  { %v1815_v24 = vpop.xlane.xlu1 %1814 }
0x17e2   :  { %v1818_v25 = vmul.f32 1.442695, %v1816_v42  ;;  %v1817_v2 = vsub.f32 %v1806_v1, %v1815_v24 }
0x17e4   :  { %4734 = vpow2.f32 %v1818_v25  ;;  %v1820_v26 = vmul.f32 1.442695, %v1817_v2 }
0x17e6   :  { %4736 = vpow2.f32 %v1820_v26 }
0x17f1   :  { %v4735_v27 = vpop.eup %4734 }
0x17f2   :  { %v1822_v28 = vsel %vm568_vm7, %v4735_v27, 0.0 }
0x17f3   :  { %v4737_v30 = vpop.eup %4736  ;;  %1823 = vadd.xlane.f32.xlu1 %v1822_v28 }
0x17f4   :  { %v1825_v32 = vsel %vm568_vm7, %v4737_v30, 0.0 }
0x17f5   :  { %1826 = vadd.xlane.f32.xlu0 %v1825_v32 }
0x187c   :  { %v1824_v33 = vpop.xlane.xlu1 %1823 }
0x187d   :  { %4738 = vrcp.f32 %v1824_v33 }
0x187e   :  { %v1827_v34 = vpop.xlane.xlu0 %1826 }
0x187f   :  { %4740 = vrcp.f32 %v1827_v34 }
0x188a   :  { %v4739_v22 = vpop.eup %4738 }
0x188b   :  { %v1830_v23 = vmul.f32 %v4739_v22, %v4735_v27 }
0x188c   :  { %v4741_v35 = vpop.eup %4740 }
0x188d   :  { %4428 = vmatmul.mubr.msk.f32.vlgmr.msra.gmra.mxu1 %vm591_vm8, %v1830_v23  ;;  %v1831_v29 = vmul.f32 %v4741_v35, %v4737_v30 }
0x188e   :  { %4436 = vmatpush3.msra.mxu1 %v5173_v41  ;;  %4451 = vmatprep.mubr.msk.f32.mxu1 %vm4903_vm0, %v4902_v0 }
0x188f   :  { %4433 = vmatmul.mubr.msk.f32.vlgmr.msra.gmra.mxu0 %vm591_vm8, %v1831_v29  ;;  %4437 = vmatprep.subr.mxu1 %v4902_v0 }
0x1890   :  { %4438 = vmatpush3.msra.mxu1 %v5178_v47  ;;  %4455 = vmatpush3.msra.mxu0 %v4985_v9 }
0x1891   :  { %4439 = vmatprep.subr.mxu1 %v4902_v0  ;;  %4456 = vmatprep.subr.mxu0 %v4902_v0 }
0x1892   :  { %4440 = vmatpush3.msra.mxu1 %v5185_v48  ;;  %4457 = vmatpush3.msra.mxu0 %v4993_v10 }
0x1893   :  { %4441 = vmatprep.subr.mxu1 %v4902_v0  ;;  %4458 = vmatprep.subr.mxu0 %v4902_v0 }
0x1894   :  { %4442 = vmatpush3.msra.mxu1 %v5192_v50  ;;  %4459 = vmatpush3.msra.mxu0 %v5002_v11 }
0x1895   :  { %4443 = vmatprep.subr.mxu1 %v4902_v0  ;;  %4460 = vmatprep.subr.mxu0 %v4902_v0 }
0x1896   :  { %4444 = vmatpush3.msra.mxu1 %v5199_v53  ;;  %4461 = vmatpush3.msra.mxu0 %v5009_v12 }
0x1897   :  { %4445 = vmatprep.subr.mxu1 %v4902_v0  ;;  %4462 = vmatprep.subr.mxu0 %v4902_v0 }
0x1898   :  { %4446 = vmatpush3.msra.mxu1 %v5206_v54  ;;  %4463 = vmatpush3.msra.mxu0 %v5016_v13 }
0x1899   :  { %4447 = vmatprep.subr.mxu1 %v4902_v0  ;;  %4464 = vmatprep.subr.mxu0 %v4902_v0 }
0x189a   :  { %4448 = vmatpush3.msra.mxu1 %v5213_v55  ;;  %4465 = vmatpush3.msra.mxu0 %v5023_v14 }
0x189b   :  { %4449 = vmatprep.subr.mxu1 %v4902_v0  ;;  %4466 = vmatprep.subr.mxu0 %v4902_v0 }
0x189c   :  { %4450 = vmatpush3.msra.mxu1 %v5222_v56  ;;  %4467 = vmatpush3.msra.mxu0 %v5030_v15 }
0x189d   :  { %4468 = vmatprep.subr.mxu0 %v4902_v0  ;;  %4474 = vmatprep.mubr.msk.f32.mxu0 %vm4903_vm0, %v4902_v0 }
0x189e   :  { %4469 = vmatpush3.msra.mxu0 %v5037_v16  ;;  %4477 = vmatprep.subr.mxu1 %v4902_v0 }
0x189f   :  { %4470 = vmatprep.subr.mxu0 %v4902_v0 }
0x18a0   :  { %4471 = vmatpush3.msra.mxu0 %v5044_v17 }
0x18a1   :  { %4472 = vmatprep.subr.mxu0 %v4902_v0 }
0x18a2   :  { %4473 = vmatpush3.msra.mxu0 %v5051_v18 }
0x18a3   :  { %4488 = vmatprep.subr.mxu0 %v4902_v0 }
0x194d   :  { %v1901_v9 = vpop.f32.mrf.mxu1 }
0x194f   :  { %v4429_v10 = vpop.f32.mrf.mxu1  ;;  %v1974_v11 = vpop.f32.mrf.mxu0 }
0x1950   :  { %v1981_v12 = vrot.slane %v1974_v11, 7 }
0x1951   :  { %v4434_v13 = vpop.f32.mrf.mxu0 }
0x1952   :  { %v1982_v14 = vsel %vm200_vm2, %v1981_v12, %v1901_v9  ;;  %v5527_v9 = vld [vmem:[%s5927_s4] ss:$0 sm:$0xff] }
0x1953   :  { %1983 = vrot.lane.b32.xlu0 %v1982_v14, %s4906_s6 }
0x1957   :  { %2081 = vrot.lane.b32.xlu0 %v5390_v38, %s4908_s23 }
0x19c5   :  { %v1984_v15 = vpop.permute.xlu0 %1983 }
0x19c6   :  { %v1986_v16 = vsel %vm86_vm1, %v5394_v39, %v1984_v15 }
0x19c7   :  { %4452 = vmatmul.mubr.msk.f32.vlgmr.msra.gmra.mxu1 %vm753_vm9, %v1986_v16 }
0x19c8   :  { %4478 = vmatpush3.msra.mxu1 %v5083_v43  ;;  %4485 = vmatprep.mubr.msk.f32.mxu1 %vm4903_vm0, %v4902_v0 }
0x19c9   :  { %4479 = vmatprep.subr.mxu1 %v4902_v0  ;;  %v2082_v6 = vpop.permute.xlu0 %2081 }
0x19ca   :  { %4480 = vmatpush3.msra.mxu1 %v5085_v44 }
0x19cb   :  { %4481 = vmatprep.subr.mxu1 %v4902_v0 }
0x19cc   :  { %4482 = vmatpush3.msra.mxu1 %v5089_v45 }
0x19cd   :  { %4483 = vmatprep.subr.mxu1 %v4902_v0 }
0x19ce   :  { %4484 = vmatpush3.msra.mxu1 %v5093_v46 }
0x19cf   :  { %4493 = vmatprep.subr.mxu1 %v4902_v0 }
0x1a87   :  { %v2056_v17 = vpop.f32.mrf.mxu1 }
0x1a88   :  { %v2057_v18 = vadd.f32 %v5246_v49, %v2056_v17  ;;  %v5534_v17 = vld [vmem:[#allocation2] sm:$0xff] }
0x1a89   :  { %v4453_v43 = vpop.f32.mrf.mxu1 }
0x1a8a   :  { %v2060_v37 = vsel %vm827_vm10, %v2057_v18, -inf }
0x1a8b   :  { %2061 = vmax.xlane.f32.xlu1 %v2060_v37 }
0x1b14   :  { %v2062_v38 = vpop.xlane.xlu1 %2061 }
0x1b15   :  { %v2063_v39 = vsub.f32 %v2057_v18, %v2062_v38 }
0x1b17   :  { %v2064_v44 = vmul.f32 1.442695, %v2063_v39 }
0x1b19   :  { %4742 = vpow2.f32 %v2064_v44 }
0x1b26   :  { %v4743_v8 = vpop.eup %4742 }
0x1b27   :  { %v2066_v45 = vsel %vm827_vm10, %v4743_v8, 0.0 }
0x1b28   :  { %2067 = vadd.xlane.f32.xlu1 %v2066_v45 }
0x1bb1   :  { %v2068_v40 = vpop.xlane.xlu1 %2067 }
0x1bb2   :  { %4744 = vlog2.f32 %v2068_v40 }
0x1bbf   :  { %v4745_v46 = vpop.eup %4744 }
0x1bc0   :  { %v2070_v58 = vmul.f32 0.6931472, %v4745_v46 }
0x1bc2   :  { %v2071_v60 = vadd.f32 %v2070_v58, %v2062_v38 }
0x1bc4   :  { %v5483_v61 = vsub.f32 %v2057_v18, %v2071_v60  ;;  %v5541_v18 = vld [vmem:[#allocation2 + $0x8] sm:$0xff] }
0x1bc6   :  { %v2073_v62 = vsel %vm827_vm10, %v5483_v61, -inf }
0x1bc7   :  { %2074 = vmax.index.xlane.f32.xlu1 %v2073_v62 }
0x1bd8   :  { %2078 = vrot.lane.b32.xlu1 %v1982_v14, %s4904_s0 }
0x1c50   :  { %v2075_v63 = vpop.xlane.xlu1 %2074 }
0x1c51   :  { %vm2076_vm13 = vcmp.eq.s32.totalorder %v5058_v20, %v2075_v63 }
0x1c52   :  { %v2077_v4 = vsel %vm2076_vm13, 1.0, %v4902_v0 }
0x1c54   :  { %v2079_v57 = vpop.permute.xlu1 %2078 }
0x1c55   :  { %v2084_v52 = vsel %vm205_vm4, %v2077_v4, %v2079_v57 }
0x1c56   :  { %v2085_v1 = vsel %vm207_vm5, %v2084_v52, %v2082_v6 }
0x1c57   :  { %4475 = vmatmul.mubr.msk.f32.vlgmr.msra.gmra.mxu0 %vm215_vm6, %v2085_v1 }
0x1c58   :  { %4489 = vmatpush3.xpose.msk.msra.mxu0 %vm86_vm1, %v5104_v51  ;;  %4490 = vmatprep.mubr.msk.f32.mxu0 %vm4903_vm0, %v4902_v0 }
0x1c59   :  { %4498 = vmatprep.subr.mxu0 %v4902_v0 }
0x1d17   :  { %v2155_v7 = vpop.f32.mrf.mxu0 }
0x1d18   :  { %v2156_v21 = vadd.f32 %v5501_v19, %v2155_v7 }
0x1d19   :  { %v4476_v42 = vpop.f32.mrf.mxu0 }
0x1d1a   :  { %4746 = vtanh.f32 %v2156_v21  ;;  %v3991_v25 = vmul.f32 -1.442695, %v2156_v21 }
0x1d1c   :  { %4748 = vpow2.f32 %v3991_v25  ;;  %v5561_v25 = vld [vmem:[%s5924_s1 + $0x48] sm:$0xff] }
0x1d27   :  { %v4747_v24 = vpop.eup %4746 }
0x1d28   :  { %2168 = vrot.lane.b32.xlu0 %v4747_v24, %s4905_s25 }
0x1d29   :  { %v4749_v2 = vpop.eup %4748 }
0x1d2a   :  { %v2162_v26 = vadd.f32 1.0, %v4749_v2  ;;  %v5639_v2 = vld [vmem:[%s5924_s1] sm:$0xff] }
0x1d2c   :  { %4750 = vrcp.f32 %v2162_v26 }
0x1d39   :  { %v4751_v27 = vpop.eup %4750 }
0x1d3a   :  { %v2166_v32 = vmul.f32 %v4751_v27, %v5386_v36 }
0x1d9a   :  { %v2169_v28 = vpop.permute.xlu0 %2168 }
0x1d9b   :  { %v2171_v30 = vmul.f32 %v4751_v27, %v2169_v28 }
0x1d9d   :  { %2173 = vrot.lane.b32.xlu0 %v2171_v30, %s4906_s6 }
0x1e0f   :  { %v2174_v33 = vpop.permute.xlu0 %2173 }
0x1e10   :  { %v5507_v34 = vadd.f32 %v2174_v33, %v2166_v32 }
0x1e12   :  { %4752 = vtanh.f32 %v5507_v34 }
0x1e1f   :  { %v4753_v22 = vpop.eup %4752 }
0x1e20   :  { %2179 = vrot.lane.b32.xlu1 %v4753_v22, %s4905_s25 }
0x1e92   :  { %v2180_v23 = vpop.permute.xlu1 %2179 }
0x1e93   :  { %v5511_v35 = vmul.f32 %v4751_v27, %v2180_v23 }
0x1e95   :  { %2184 = vrot.lane.b32.xlu0 %v5511_v35, %s4906_s6 }
0x1f07   :  { %v5515_v29 = vpop.permute.xlu0 %2184 }
0x1f08   :  { %4486 = vmatmul.mubr.msk.f32.vlgmr.msra.gmra.mxu1 %vm86_vm1, %v5515_v29 }
0x1f09   :  { %4494 = vmatpush3.xpose.msk.msra.mxu1 %vm86_vm1, %v5126_v5  ;;  %4495 = vmatprep.mubr.msk.f32.mxu1 %vm4903_vm0, %v4902_v0 }
0x1f0a   :  { %4503 = vmatprep.subr.mxu1 %v4902_v0 }
0x1fc8   :  { %v2254_v36 = vpop.f32.mrf.mxu1 }
0x1fc9   :  { %v2255_v10 = vadd.f32 %v5527_v9, %v2254_v36  ;;  %v5650_v36 = vld [vmem:[#allocation4 + $0x18] sm:$0xff] }
0x1fca   :  { %v4487_v11 = vpop.f32.mrf.mxu1 }
0x1fcb   :  { %v2258_v12 = vmax.f32 %v2255_v10, 0.0  ;;  %v5656_v10 = vld [vmem:[#allocation4 + $0x10] sm:$0xff] }
0x1fcd   :  { %v2266_v13 = vrot.slane %v2258_v12, %v5121_v59 }
0x1fcf   :  { %v2267_v14 = vcombine.high %v2266_v13, %v2266_v13  ;;  %v2274_v15 = vrot.slane %v2266_v13, %v5121_v59 }
0x1fd1   :  { %v2281_v16 = vrot.slane %v2267_v14, %v5121_v59  ;;  %4491 = vmatmul.mubr.msk.f32.vlgmr.msra.gmra.mxu0 %vm86_vm1, %v2274_v15 }
0x1fd2   :  { %4499 = vmatpush3.msra.mxu0 %v5534_v17  ;;  %4500 = vmatprep.mubr.msk.f32.mxu0 %vm4903_vm0, %v4902_v0 }
0x1fd3   :  { %4496 = vmatmul.mubr.msk.f32.vlgmr.msra.gmra.mxu1 %vm86_vm1, %v2281_v16  ;;  %4508 = vmatprep.subr.mxu0 %v4902_v0 }
0x1fd4   :  { %4504 = vmatpush3.msra.mxu1 %v5541_v18  ;;  %4505 = vmatprep.mubr.msk.f32.mxu1 %vm4903_vm0, %v4902_v0 }
0x1fd5   :  { %4527 = vmatprep.subr.mxu1 %v4902_v0 }
0x2091   :  { %v2350_v43 = vpop.f32.mrf.mxu0 }
0x2092   :  { %v2426_v37 = vsel %vm568_vm7, %v2350_v43, -inf }
0x2093   :  { %v2422_v38 = vpop.f32.mrf.mxu1  ;;  %2427 = vmax.xlane.f32.xlu0 %v2426_v37  ;;  %v4492_v39 = vpop.f32.mrf.mxu0 }
0x2094   :  { %v2429_v44 = vsel %vm568_vm7, %v2422_v38, -inf }
0x2095   :  { %2430 = vmax.xlane.f32.xlu1 %v2429_v44  ;;  %v4497_v8 = vpop.f32.mrf.mxu1 }
0x211c   :  { %v2428_v45 = vpop.xlane.xlu0 %2427 }
0x211d   :  { %v2432_v40 = vsub.f32 %v2350_v43, %v2428_v45 }
0x211e   :  { %v2431_v46 = vpop.xlane.xlu1 %2430 }
0x211f   :  { %v2434_v58 = vmul.f32 1.442695, %v2432_v40  ;;  %v2433_v60 = vsub.f32 %v2422_v38, %v2431_v46 }
0x2121   :  { %4754 = vpow2.f32 %v2434_v58  ;;  %v2436_v62 = vmul.f32 1.442695, %v2433_v60 }
0x2123   :  { %4756 = vpow2.f32 %v2436_v62 }
0x212e   :  { %v4755_v63 = vpop.eup %4754 }
0x212f   :  { %v2438_v4 = vsel %vm568_vm7, %v4755_v63, 0.0 }
0x2130   :  { %v4757_v57 = vpop.eup %4756  ;;  %2439 = vadd.xlane.f32.xlu1 %v2438_v4 }
0x2131   :  { %v2441_v6 = vsel %vm568_vm7, %v4757_v57, 0.0 }
0x2132   :  { %2442 = vadd.xlane.f32.xlu0 %v2441_v6 }
0x21b9   :  { %v2440_v52 = vpop.xlane.xlu1 %2439 }
0x21ba   :  { %4758 = vrcp.f32 %v2440_v52 }
0x21bb   :  { %v2443_v1 = vpop.xlane.xlu0 %2442 }
0x21bc   :  { %4760 = vrcp.f32 %v2443_v1 }
0x21c7   :  { %v4759_v7 = vpop.eup %4758 }
0x21c8   :  { %v2446_v21 = vmul.f32 %v4759_v7, %v4755_v63 }
0x21c9   :  { %v4761_v42 = vpop.eup %4760 }
0x21ca   :  { %4501 = vmatmul.mubr.msk.f32.vlgmr.msra.gmra.mxu0 %vm591_vm8, %v2446_v21  ;;  %v2447_v24 = vmul.f32 %v4761_v42, %v4757_v57 }
0x21cb   :  { %4509 = vmatpush3.msra.mxu0 %v5173_v41  ;;  %4524 = vmatprep.mubr.msk.f32.mxu0 %vm4903_vm0, %v4902_v0  ;;  %v5570_v41 = vld [vmem:[%s5924_s1 + $0x40] sm:$0xff] }
0x21cc   :  { %4506 = vmatmul.mubr.msk.f32.vlgmr.msra.gmra.mxu1 %vm591_vm8, %v2447_v24  ;;  %4510 = vmatprep.subr.mxu0 %v4902_v0 }
0x21cd   :  { %4511 = vmatpush3.msra.mxu0 %v5178_v47  ;;  %4528 = vmatpush3.msra.mxu1 %v5561_v25  ;;  %v5579_v47 = vld [vmem:[%s5924_s1 + $0x38] sm:$0xff] }
0x21ce   :  { %4512 = vmatprep.subr.mxu0 %v4902_v0  ;;  %4529 = vmatprep.subr.mxu1 %v4902_v0 }
0x21cf   :  { %4513 = vmatpush3.msra.mxu0 %v5185_v48  ;;  %4530 = vmatpush3.msra.mxu1 %v5570_v41  ;;  %v5588_v48 = vld [vmem:[%s5924_s1 + $0x30] sm:$0xff] }
0x21d0   :  { %4514 = vmatprep.subr.mxu0 %v4902_v0  ;;  %4531 = vmatprep.subr.mxu1 %v4902_v0 }
0x21d1   :  { %4515 = vmatpush3.msra.mxu0 %v5192_v50  ;;  %4532 = vmatpush3.msra.mxu1 %v5579_v47  ;;  %v5597_v50 = vld [vmem:[%s5924_s1 + $0x28] sm:$0xff] }
0x21d2   :  { %4516 = vmatprep.subr.mxu0 %v4902_v0  ;;  %4533 = vmatprep.subr.mxu1 %v4902_v0 }
0x21d3   :  { %4517 = vmatpush3.msra.mxu0 %v5199_v53  ;;  %4534 = vmatpush3.msra.mxu1 %v5588_v48  ;;  %v5606_v53 = vld [vmem:[%s5924_s1 + $0x20] sm:$0xff] }
0x21d4   :  { %4518 = vmatprep.subr.mxu0 %v4902_v0  ;;  %4535 = vmatprep.subr.mxu1 %v4902_v0 }
0x21d5   :  { %4519 = vmatpush3.msra.mxu0 %v5206_v54  ;;  %4536 = vmatpush3.msra.mxu1 %v5597_v50  ;;  %v5615_v54 = vld [vmem:[%s5924_s1 + $0x18] sm:$0xff] }
0x21d6   :  { %4520 = vmatprep.subr.mxu0 %v4902_v0  ;;  %4537 = vmatprep.subr.mxu1 %v4902_v0 }
0x21d7   :  { %4521 = vmatpush3.msra.mxu0 %v5213_v55  ;;  %4538 = vmatpush3.msra.mxu1 %v5606_v53  ;;  %v5624_v55 = vld [vmem:[%s5924_s1 + $0x10] sm:$0xff] }
0x21d8   :  { %4522 = vmatprep.subr.mxu0 %v4902_v0  ;;  %4539 = vmatprep.subr.mxu1 %v4902_v0 }
0x21d9   :  { %4523 = vmatpush3.msra.mxu0 %v5222_v56  ;;  %4540 = vmatpush3.msra.mxu1 %v5615_v54  ;;  %v5632_v56 = vld [vmem:[%s5924_s1 + $0x8] sm:$0xff] }
0x21da   :  { %4541 = vmatprep.subr.mxu1 %v4902_v0  ;;  %4547 = vmatprep.mubr.msk.f32.mxu1 %vm4903_vm0, %v4902_v0 }
0x21db   :  { %4542 = vmatpush3.msra.mxu1 %v5624_v55  ;;  %4550 = vmatprep.subr.mxu0 %v4902_v0 }
0x21dc   :  { %4543 = vmatprep.subr.mxu1 %v4902_v0 }
0x21dd   :  { %4544 = vmatpush3.msra.mxu1 %v5632_v56 }
0x21de   :  { %4545 = vmatprep.subr.mxu1 %v4902_v0 }
0x21df   :  { %4546 = vmatpush3.msra.mxu1 %v5639_v2 }
0x21e0   :  { %4561 = vmatprep.subr.mxu1 %v4902_v0 }
0x228a   :  { %v2517_v26 = vpop.f32.mrf.mxu0 }
0x228c   :  { %v4502_v27 = vpop.f32.mrf.mxu0  ;;  %v2590_v28 = vpop.f32.mrf.mxu1 }
0x228d   :  { %v2597_v30 = vrot.slane %v2590_v28, 7 }
0x228e   :  { %v4507_v32 = vpop.f32.mrf.mxu1 }
0x228f   :  { %v2598_v33 = vsel %vm200_vm2, %v2597_v30, %v2517_v26 }
0x2290   :  { %2599 = vrot.lane.b32.xlu0 %v2598_v33, %s4906_s6 }
0x2294   :  { %2697 = vrot.lane.b32.xlu0 %v5511_v35, %s4908_s23  ;;  %v5660_v35 = vld [vmem:[#allocation4 + $0x8] sm:$0xff] }
0x2302   :  { %v2600_v22 = vpop.permute.xlu0 %2599 }
0x2303   :  { %v2602_v23 = vsel %vm86_vm1, %v5515_v29, %v2600_v22  ;;  %v5664_v29 = vld [vmem:[#allocation4] sm:$0xff] }
0x2304   :  { %4525 = vmatmul.mubr.msk.f32.vlgmr.msra.gmra.mxu0 %vm753_vm9, %v2602_v23 }
0x2305   :  { %4551 = vmatpush3.msra.mxu0 %v5650_v36  ;;  %4558 = vmatprep.mubr.msk.f32.mxu0 %vm4903_vm0, %v4902_v0 }
0x2306   :  { %4552 = vmatprep.subr.mxu0 %v4902_v0  ;;  %v2698_v62 = vpop.permute.xlu0 %2697 }
0x2307   :  { %4553 = vmatpush3.msra.mxu0 %v5656_v10 }
0x2308   :  { %4554 = vmatprep.subr.mxu0 %v4902_v0 }
0x2309   :  { %4555 = vmatpush3.msra.mxu0 %v5660_v35 }
0x230a   :  { %4556 = vmatprep.subr.mxu0 %v4902_v0 }
0x230b   :  { %4557 = vmatpush3.msra.mxu0 %v5664_v29 }
0x230c   :  { %4566 = vmatprep.subr.mxu0 %v4902_v0 }
0x23c4   :  { %v2672_v11 = vpop.f32.mrf.mxu0 }
0x23c5   :  { %v2673_v12 = vadd.f32 %v5246_v49, %v2672_v11 }
0x23c6   :  { %v4526_v13 = vpop.f32.mrf.mxu0 }
0x23c7   :  { %v2676_v14 = vsel %vm827_vm10, %v2673_v12, -inf }
0x23c8   :  { %2677 = vmax.xlane.f32.xlu1 %v2676_v14 }
0x2451   :  { %v2678_v15 = vpop.xlane.xlu1 %2677 }
0x2452   :  { %v2679_v16 = vsub.f32 %v2673_v12, %v2678_v15 }
0x2454   :  { %v2680_v43 = vmul.f32 1.442695, %v2679_v16 }
0x2456   :  { %4762 = vpow2.f32 %v2680_v43 }
0x2463   :  { %v4763_v37 = vpop.eup %4762 }
0x2464   :  { %v2682_v38 = vsel %vm827_vm10, %v4763_v37, 0.0 }
0x2465   :  { %2683 = vadd.xlane.f32.xlu1 %v2682_v38 }
0x24ee   :  { %v2684_v39 = vpop.xlane.xlu1 %2683 }
0x24ef   :  { %4764 = vlog2.f32 %v2684_v39 }
0x24fc   :  { %v4765_v44 = vpop.eup %4764 }
0x24fd   :  { %v2686_v8 = vmul.f32 0.6931472, %v4765_v44 }
0x24ff   :  { %v2687_v45 = vadd.f32 %v2686_v8, %v2678_v15 }
0x2501   :  { %v5671_v40 = vsub.f32 %v2673_v12, %v2687_v45 }
0x2503   :  { %v2689_v49 = vsel %vm827_vm10, %v5671_v40, -inf }
0x2504   :  { %2690 = vmax.index.xlane.f32.xlu1 %v2689_v49 }
0x2515   :  { %2694 = vrot.lane.b32.xlu1 %v2598_v33, %s4904_s0 }
0x258d   :  { %v2691_v46 = vpop.xlane.xlu1 %2690 }
0x258e   :  { %vm2692_vm14 = vcmp.eq.s32.totalorder %v5058_v20, %v2691_v46 }
0x258f   :  { %v2693_v58 = vsel %vm2692_vm14, 1.0, %v4902_v0 }
0x2591   :  { %v2695_v60 = vpop.permute.xlu1 %2694 }
0x2592   :  { %v2700_v63 = vsel %vm205_vm4, %v2693_v58, %v2695_v60 }
0x2593   :  { %v2701_v4 = vsel %vm207_vm5, %v2700_v63, %v2698_v62 }
0x2594   :  { %4548 = vmatmul.mubr.msk.f32.vlgmr.msra.gmra.mxu1 %vm215_vm6, %v2701_v4 }
0x2595   :  { %4562 = vmatpush3.xpose.msk.msra.mxu1 %vm86_vm1, %v5104_v51  ;;  %4563 = vmatprep.mubr.msk.f32.mxu1 %vm4903_vm0, %v4902_v0 }
0x2596   :  { %4571 = vmatprep.subr.mxu1 %v4902_v0 }
0x2654   :  { %v2771_v57 = vpop.f32.mrf.mxu1 }
0x2655   :  { %v2772_v6 = vadd.f32 %v5501_v19, %v2771_v57 }
0x2656   :  { %v4549_v52 = vpop.f32.mrf.mxu1 }
0x2657   :  { %4766 = vtanh.f32 %v2772_v6  ;;  %v4001_v7 = vmul.f32 -1.442695, %v2772_v6 }
0x2659   :  { %4768 = vpow2.f32 %v4001_v7 }
0x2664   :  { %v4767_v1 = vpop.eup %4766 }
0x2665   :  { %2784 = vrot.lane.b32.xlu0 %v4767_v1, %s4905_s25 }
0x2666   :  { %v4769_v21 = vpop.eup %4768 }
0x2667   :  { %v2778_v42 = vadd.f32 1.0, %v4769_v21 }
0x2669   :  { %4770 = vrcp.f32 %v2778_v42 }
0x2676   :  { %v4771_v24 = vpop.eup %4770 }
0x2677   :  { %v2782_v28 = vmul.f32 %v4771_v24, %v5507_v34 }
0x26d7   :  { %v2785_v26 = vpop.permute.xlu0 %2784 }
0x26d8   :  { %v2787_v27 = vmul.f32 %v4771_v24, %v2785_v26 }
0x26da   :  { %2789 = vrot.lane.b32.xlu0 %v2787_v27, %s4906_s6 }
0x274c   :  { %v2790_v30 = vpop.permute.xlu0 %2789 }
0x274d   :  { %v5690_v32 = vadd.f32 %v2790_v30, %v2782_v28  ;;  %v5729_v28 = vld [vmem:[%s5930_s7 + $0x38] sm:$0xff]  ;;  %v5739_v30 = vld [vmem:[%s5930_s7 + $0x30] sm:$0xff] }
0x274f   :  { %4772 = vtanh.f32 %v5690_v32 }
0x275c   :  { %v4773_v33 = vpop.eup %4772 }
0x275d   :  { %2795 = vrot.lane.b32.xlu1 %v4773_v33, %s4905_s25  ;;  %v5748_v33 = vld [vmem:[%s5930_s7 + $0x28] sm:$0xff] }
0x27cf   :  { %v2796_v22 = vpop.permute.xlu1 %2795 }
0x27d0   :  { %v5694_v23 = vmul.f32 %v4771_v24, %v2796_v22 }
0x27d2   :  { %2800 = vrot.lane.b32.xlu0 %v5694_v23, %s4906_s6 }
0x2844   :  { %v5698_v11 = vpop.permute.xlu0 %2800 }
0x2845   :  { %4559 = vmatmul.mubr.msk.f32.vlgmr.msra.gmra.mxu0 %vm86_vm1, %v5698_v11 }
0x2846   :  { %4567 = vmatpush3.xpose.msk.msra.mxu0 %vm86_vm1, %v5126_v5  ;;  %4568 = vmatprep.mubr.msk.f32.mxu0 %vm4903_vm0, %v4902_v0 }
0x2847   :  { %4576 = vmatprep.subr.mxu0 %v4902_v0 }
0x2905   :  { %v2870_v34 = vpop.f32.mrf.mxu0 }
0x2906   :  { %v2871_v12 = vadd.f32 %v5527_v9, %v2870_v34 }
0x2907   :  { %v4560_v13 = vpop.f32.mrf.mxu0 }
0x2908   :  { %v2874_v14 = vmax.f32 %v2871_v12, 0.0 }
0x290a   :  { %v2882_v15 = vrot.slane %v2874_v14, %v5121_v59 }
0x290c   :  { %v2883_v16 = vcombine.high %v2882_v15, %v2882_v15  ;;  %v2890_v43 = vrot.slane %v2882_v15, %v5121_v59 }
0x290e   :  { %v2897_v37 = vrot.slane %v2883_v16, %v5121_v59  ;;  %4564 = vmatmul.mubr.msk.f32.vlgmr.msra.gmra.mxu1 %vm86_vm1, %v2890_v43 }
0x290f   :  { %4572 = vmatpush3.msra.mxu1 %v5534_v17  ;;  %4573 = vmatprep.mubr.msk.f32.mxu1 %vm4903_vm0, %v4902_v0 }
0x2910   :  { %4569 = vmatmul.mubr.msk.f32.vlgmr.msra.gmra.mxu0 %vm86_vm1, %v2897_v37  ;;  %4581 = vmatprep.subr.mxu1 %v4902_v0 }
0x2911   :  { %4577 = vmatpush3.msra.mxu0 %v5541_v18  ;;  %4578 = vmatprep.mubr.msk.f32.mxu0 %vm4903_vm0, %v4902_v0 }
0x2912   :  { %4600 = vmatprep.subr.mxu0 %v4902_v0 }
0x29ce   :  { %v2966_v38 = vpop.f32.mrf.mxu1 }
0x29cf   :  { %v3042_v39 = vsel %vm568_vm7, %v2966_v38, -inf }
0x29d0   :  { %3043 = vmax.xlane.f32.xlu0 %v3042_v39  ;;  %v4565_v44 = vpop.f32.mrf.mxu1  ;;  %v3038_v8 = vpop.f32.mrf.mxu0 }
0x29d1   :  { %v3045_v45 = vsel %vm568_vm7, %v3038_v8, -inf }
0x29d2   :  { %3046 = vmax.xlane.f32.xlu1 %v3045_v45  ;;  %v4570_v49 = vpop.f32.mrf.mxu0 }
0x2a59   :  { %v3044_v46 = vpop.xlane.xlu0 %3043 }
0x2a5a   :  { %v3048_v58 = vsub.f32 %v2966_v38, %v3044_v46 }
0x2a5b   :  { %v3047_v60 = vpop.xlane.xlu1 %3046 }
0x2a5c   :  { %v3050_v62 = vmul.f32 1.442695, %v3048_v58  ;;  %v3049_v63 = vsub.f32 %v3038_v8, %v3047_v60 }
0x2a5e   :  { %4774 = vpow2.f32 %v3050_v62  ;;  %v3052_v4 = vmul.f32 1.442695, %v3049_v63 }
0x2a60   :  { %4776 = vpow2.f32 %v3052_v4 }
0x2a6b   :  { %v4775_v57 = vpop.eup %4774 }
0x2a6c   :  { %v3054_v6 = vsel %vm568_vm7, %v4775_v57, 0.0 }
0x2a6d   :  { %v4777_v52 = vpop.eup %4776  ;;  %3055 = vadd.xlane.f32.xlu1 %v3054_v6 }
0x2a6e   :  { %v3057_v1 = vsel %vm568_vm7, %v4777_v52, 0.0 }
0x2a6f   :  { %3058 = vadd.xlane.f32.xlu0 %v3057_v1 }
0x2af6   :  { %v3056_v7 = vpop.xlane.xlu1 %3055 }
0x2af7   :  { %4778 = vrcp.f32 %v3056_v7 }
0x2af8   :  { %v3059_v21 = vpop.xlane.xlu0 %3058 }
0x2af9   :  { %4780 = vrcp.f32 %v3059_v21 }
0x2b04   :  { %v4779_v42 = vpop.eup %4778 }
0x2b05   :  { %v3062_v24 = vmul.f32 %v4779_v42, %v4775_v57 }
0x2b06   :  { %v4781_v26 = vpop.eup %4780 }
0x2b07   :  { %4574 = vmatmul.mubr.msk.f32.vlgmr.msra.gmra.mxu1 %vm591_vm8, %v3062_v24  ;;  %v3063_v27 = vmul.f32 %v4781_v26, %v4777_v52 }
0x2b08   :  { %4582 = vmatpush3.msra.mxu1 %v5729_v28  ;;  %4597 = vmatprep.mubr.msk.f32.mxu1 %vm4903_vm0, %v4902_v0 }
0x2b09   :  { %4579 = vmatmul.mubr.msk.f32.vlgmr.msra.gmra.mxu0 %vm591_vm8, %v3063_v27  ;;  %4583 = vmatprep.subr.mxu1 %v4902_v0 }
0x2b0a   :  { %4584 = vmatpush3.msra.mxu1 %v5739_v30  ;;  %4601 = vmatpush3.msra.mxu0 %v5561_v25  ;;  %v5757_v25 = vld [vmem:[%s5930_s7 + $0x20] sm:$0xff] }
0x2b0b   :  { %4585 = vmatprep.subr.mxu1 %v4902_v0  ;;  %4602 = vmatprep.subr.mxu0 %v4902_v0 }
0x2b0c   :  { %4586 = vmatpush3.msra.mxu1 %v5748_v33  ;;  %4603 = vmatpush3.msra.mxu0 %v5570_v41  ;;  %v5766_v41 = vld [vmem:[%s5930_s7 + $0x18] sm:$0xff] }
0x2b0d   :  { %4587 = vmatprep.subr.mxu1 %v4902_v0  ;;  %4604 = vmatprep.subr.mxu0 %v4902_v0 }
0x2b0e   :  { %4588 = vmatpush3.msra.mxu1 %v5757_v25  ;;  %4605 = vmatpush3.msra.mxu0 %v5579_v47  ;;  %v5775_v47 = vld [vmem:[%s5930_s7 + $0x10] sm:$0xff] }
0x2b0f   :  { %4589 = vmatprep.subr.mxu1 %v4902_v0  ;;  %4606 = vmatprep.subr.mxu0 %v4902_v0 }
0x2b10   :  { %4590 = vmatpush3.msra.mxu1 %v5766_v41  ;;  %4607 = vmatpush3.msra.mxu0 %v5588_v48  ;;  %v5784_v48 = vld [vmem:[%s5930_s7 + $0x8] sm:$0xff] }
0x2b11   :  { %4591 = vmatprep.subr.mxu1 %v4902_v0  ;;  %4608 = vmatprep.subr.mxu0 %v4902_v0 }
0x2b12   :  { %4592 = vmatpush3.msra.mxu1 %v5775_v47  ;;  %4609 = vmatpush3.msra.mxu0 %v5597_v50  ;;  %v5793_v50 = vld [vmem:[%s5930_s7] sm:$0xff] }
0x2b13   :  { %4593 = vmatprep.subr.mxu1 %v4902_v0  ;;  %4610 = vmatprep.subr.mxu0 %v4902_v0 }
0x2b14   :  { %4594 = vmatpush3.msra.mxu1 %v5784_v48  ;;  %4611 = vmatpush3.msra.mxu0 %v5606_v53 }
0x2b15   :  { %4595 = vmatprep.subr.mxu1 %v4902_v0  ;;  %4612 = vmatprep.subr.mxu0 %v4902_v0 }
0x2b16   :  { %4596 = vmatpush3.msra.mxu1 %v5793_v50  ;;  %4613 = vmatpush3.msra.mxu0 %v5615_v54 }
0x2b17   :  { %4614 = vmatprep.subr.mxu0 %v4902_v0  ;;  %4620 = vmatprep.mubr.msk.f32.mxu0 %vm4903_vm0, %v4902_v0 }
0x2b18   :  { %4615 = vmatpush3.msra.mxu0 %v5624_v55  ;;  %4623 = vmatprep.subr.mxu1 %v4902_v0 }
0x2b19   :  { %4616 = vmatprep.subr.mxu0 %v4902_v0 }
0x2b1a   :  { %4617 = vmatpush3.msra.mxu0 %v5632_v56 }
0x2b1b   :  { %4618 = vmatprep.subr.mxu0 %v4902_v0 }
0x2b1c   :  { %4619 = vmatpush3.msra.mxu0 %v5639_v2 }
0x2b1d   :  { %4634 = vmatprep.subr.mxu0 %v4902_v0 }
0x2bc7   :  { %v3133_v53 = vpop.f32.mrf.mxu1 }
0x2bc9   :  { %v4575_v54 = vpop.f32.mrf.mxu1  ;;  %v3206_v22 = vpop.f32.mrf.mxu0 }
0x2bca   :  { %v3213_v34 = vrot.slane %v3206_v22, 7 }
0x2bcb   :  { %v4580_v12 = vpop.f32.mrf.mxu0 }
0x2bcc   :  { %v3214_v13 = vsel %vm200_vm2, %v3213_v34, %v3133_v53 }
0x2bcd   :  { %3215 = vrot.lane.b32.xlu0 %v3214_v13, %s4906_s6 }
0x2bd1   :  { %3313 = vrot.lane.b32.xlu0 %v5694_v23, %s4908_s23 }
0x2c3f   :  { %v3216_v55 = vpop.permute.xlu0 %3215 }
0x2c40   :  { %v3218_v56 = vsel %vm86_vm1, %v5698_v11, %v3216_v55 }
0x2c41   :  { %4598 = vmatmul.mubr.msk.f32.vlgmr.msra.gmra.mxu1 %vm753_vm9, %v3218_v56 }
0x2c42   :  { %4624 = vmatpush3.msra.mxu1 %v5650_v36  ;;  %4631 = vmatprep.mubr.msk.f32.mxu1 %vm4903_vm0, %v4902_v0  ;;  %v5827_v36 = vld [vmem:[%s5931_s8] ss:$0 sm:$0xff]  ;;  %s4909_s8 = smov 48  }
0x2c43   :  { %4625 = vmatprep.subr.mxu1 %v4902_v0  ;;  %v3314_v58 = vpop.permute.xlu0 %3313 }
0x2c44   :  { %4626 = vmatpush3.msra.mxu1 %v5656_v10 }
0x2c45   :  { %4627 = vmatprep.subr.mxu1 %v4902_v0 }
0x2c46   :  { %4628 = vmatpush3.msra.mxu1 %v5660_v35 }
0x2c47   :  { %4629 = vmatprep.subr.mxu1 %v4902_v0 }
0x2c48   :  { %4630 = vmatpush3.msra.mxu1 %v5664_v29 }
0x2c49   :  { %4639 = vmatprep.subr.mxu1 %v4902_v0 }
0x2d01   :  { %v3288_v2 = vpop.f32.mrf.mxu1 }
0x2d02   :  { %v3289_v23 = vadd.f32 %v5827_v36, %v3288_v2 }
0x2d03   :  { %v4599_v11 = vpop.f32.mrf.mxu1 }
0x2d04   :  { %v3292_v10 = vsel %vm827_vm10, %v3289_v23, -inf }
0x2d05   :  { %3293 = vmax.xlane.f32.xlu1 %v3292_v10 }
0x2d8e   :  { %v3294_v14 = vpop.xlane.xlu1 %3293 }
0x2d8f   :  { %v3295_v35 = vsub.f32 %v3289_v23, %v3294_v14 }
0x2d91   :  { %v3296_v15 = vmul.f32 1.442695, %v3295_v35 }
0x2d93   :  { %4782 = vpow2.f32 %v3296_v15 }
0x2da0   :  { %v4783_v16 = vpop.eup %4782 }
0x2da1   :  { %v3298_v29 = vsel %vm827_vm10, %v4783_v16, 0.0 }
0x2da2   :  { %3299 = vadd.xlane.f32.xlu1 %v3298_v29 }
0x2e2b   :  { %v3300_v43 = vpop.xlane.xlu1 %3299 }
0x2e2c   :  { %4784 = vlog2.f32 %v3300_v43 }
0x2e39   :  { %v4785_v37 = vpop.eup %4784 }
0x2e3a   :  { %v3302_v38 = vmul.f32 0.6931472, %v4785_v37 }
0x2e3c   :  { %v3303_v39 = vadd.f32 %v3302_v38, %v3294_v14 }
0x2e3e   :  { %v5832_v44 = vsub.f32 %v3289_v23, %v3303_v39 }
0x2e40   :  { %v3305_v8 = vsel %vm827_vm10, %v5832_v44, -inf }
0x2e41   :  { %3306 = vmax.index.xlane.f32.xlu1 %v3305_v8 }
0x2e52   :  { %3310 = vrot.lane.b32.xlu1 %v3214_v13, %s4904_s0 }
0x2eca   :  { %v3307_v45 = vpop.xlane.xlu1 %3306 }
0x2ecb   :  { %vm3308_vm15 = vcmp.eq.s32.totalorder %v5058_v20, %v3307_v45 }
0x2ecc   :  { %v3309_v49 = vsel %vm3308_vm15, 1.0, %v4902_v0 }
0x2ece   :  { %v3311_v46 = vpop.permute.xlu1 %3310 }
0x2ecf   :  { %v3316_v60 = vsel %vm205_vm4, %v3309_v49, %v3311_v46 }
0x2ed0   :  { %v3317_v62 = vsel %vm207_vm5, %v3316_v60, %v3314_v58 }
0x2ed1   :  { %4621 = vmatmul.mubr.msk.f32.vlgmr.msra.gmra.mxu0 %vm215_vm6, %v3317_v62 }
0x2ed2   :  { %4635 = vmatpush3.xpose.msk.msra.mxu0 %vm86_vm1, %v5104_v51  ;;  %4636 = vmatprep.mubr.msk.f32.mxu0 %vm4903_vm0, %v4902_v0 }
0x2ed3   :  { %4644 = vmatprep.subr.mxu0 %v4902_v0 }
0x2f91   :  { %v3387_v63 = vpop.f32.mrf.mxu0 }
0x2f92   :  { %v3388_v20 = vadd.f32 %v5501_v19, %v3387_v63 }
0x2f93   :  { %v4622_v4 = vpop.f32.mrf.mxu0 }
0x2f94   :  { %4786 = vtanh.f32 %v3388_v20  ;;  %v4011_v6 = vmul.f32 -1.442695, %v3388_v20 }
0x2f96   :  { %4788 = vpow2.f32 %v4011_v6 }
0x2fa1   :  { %v4787_v57 = vpop.eup %4786 }
0x2fa2   :  { %3400 = vrot.lane.b32.xlu0 %v4787_v57, %s4905_s25 }
0x2fa3   :  { %v4789_v52 = vpop.eup %4788 }
0x2fa4   :  { %v3394_v1 = vadd.f32 1.0, %v4789_v52 }
0x2fa6   :  { %4790 = vrcp.f32 %v3394_v1 }
0x2fb3   :  { %v4791_v7 = vpop.eup %4790 }
0x2fb4   :  { %v3398_v42 = vmul.f32 %v4791_v7, %v5690_v32 }
0x3014   :  { %v3401_v51 = vpop.permute.xlu0 %3400 }
0x3015   :  { %v3403_v21 = vmul.f32 %v4791_v7, %v3401_v51 }
0x3017   :  { %3405 = vrot.lane.b32.xlu0 %v3403_v21, %s4906_s6 }
0x3089   :  { %v3406_v24 = vpop.permute.xlu0 %3405 }
0x308a   :  { %v3408_v26 = vadd.f32 %v3406_v24, %v3398_v42 }
0x308c   :  { %4792 = vtanh.f32 %v3408_v26 }
0x3099   :  { %v4793_v19 = vpop.eup %4792 }
0x309a   :  { %3411 = vrot.lane.b32.xlu1 %v4793_v19, %s4905_s25 }
0x310c   :  { %v3412_v27 = vpop.permute.xlu1 %3411 }
0x310d   :  { %v3414_v53 = vmul.f32 %v4791_v7, %v3412_v27 }
0x310f   :  { %3416 = vrot.lane.b32.xlu0 %v3414_v53, %s4906_s6 }
0x3181   :  { %v5853_v54 = vpop.permute.xlu0 %3416 }
0x3182   :  { %4632 = vmatmul.mubr.msk.f32.vlgmr.msra.gmra.mxu1 %vm86_vm1, %v5853_v54 }
0x3183   :  { %4640 = vmatpush3.xpose.msk.msra.mxu1 %vm86_vm1, %v5126_v5  ;;  %4641 = vmatprep.mubr.msk.f32.mxu1 %vm4903_vm0, %v4902_v0 }
0x3184   :  { %4649 = vmatprep.subr.mxu1 %v4902_v0 }
0x3242   :  { %v3486_v32 = vpop.f32.mrf.mxu1 }
0x3243   :  { %v3487_v22 = vadd.f32 %v5527_v9, %v3486_v32 }
0x3244   :  { %v4633_v34 = vpop.f32.mrf.mxu1 }
0x3245   :  { %v3490_v12 = vmax.f32 %v3487_v22, 0.0 }
0x3247   :  { %v3498_v13 = vrot.slane %v3490_v12, %v5121_v59 }
0x3249   :  { %v3499_v55 = vcombine.high %v3498_v13, %v3498_v13  ;;  %v3506_v56 = vrot.slane %v3498_v13, %v5121_v59 }
0x324b   :  { %v3513_v2 = vrot.slane %v3499_v55, %v5121_v59  ;;  %4637 = vmatmul.mubr.msk.f32.vlgmr.msra.gmra.mxu0 %vm86_vm1, %v3506_v56 }
0x324c   :  { %4645 = vmatpush3.msra.mxu0 %v5534_v17  ;;  %4646 = vmatprep.mubr.msk.f32.mxu0 %vm4903_vm0, %v4902_v0 }
0x324d   :  { %4642 = vmatmul.mubr.msk.f32.vlgmr.msra.gmra.mxu1 %vm86_vm1, %v3513_v2  ;;  %4654 = vmatprep.subr.mxu0 %v4902_v0 }
0x324e   :  { %4650 = vmatpush3.msra.mxu1 %v5541_v18  ;;  %4651 = vmatprep.mubr.msk.f32.mxu1 %vm4903_vm0, %v4902_v0 }
0x330b   :  { %v3582_v5 = vpop.f32.mrf.mxu0 }
0x330c   :  { %v3658_v9 = vsel %vm568_vm7, %v3582_v5, -inf }
0x330d   :  { %v3654_v59 = vpop.f32.mrf.mxu1  ;;  %3659 = vmax.xlane.f32.xlu0 %v3658_v9  ;;  %v4638_v23 = vpop.f32.mrf.mxu0 }
0x330e   :  { %v3661_v17 = vsel %vm568_vm7, %v3654_v59, -inf }
0x330f   :  { %3662 = vmax.xlane.f32.xlu1 %v3661_v17  ;;  %v4643_v11 = vpop.f32.mrf.mxu1 }
0x3396   :  { %v3660_v10 = vpop.xlane.xlu0 %3659 }
0x3397   :  { %v3664_v14 = vsub.f32 %v3582_v5, %v3660_v10 }
0x3398   :  { %v3663_v35 = vpop.xlane.xlu1 %3662 }
0x3399   :  { %v3666_v15 = vmul.f32 1.442695, %v3664_v14  ;;  %v3665_v16 = vsub.f32 %v3654_v59, %v3663_v35 }
0x339b   :  { %4794 = vpow2.f32 %v3666_v15  ;;  %v3668_v18 = vmul.f32 1.442695, %v3665_v16 }
0x339d   :  { %4796 = vpow2.f32 %v3668_v18 }
0x33a8   :  { %v4795_v29 = vpop.eup %4794 }
0x33a9   :  { %v3670_v43 = vsel %vm568_vm7, %v4795_v29, 0.0 }
0x33aa   :  { %v4797_v37 = vpop.eup %4796  ;;  %3671 = vadd.xlane.f32.xlu1 %v3670_v43 }
0x33ab   :  { %v3673_v38 = vsel %vm568_vm7, %v4797_v37, 0.0 }
0x33ac   :  { %3674 = vadd.xlane.f32.xlu0 %v3673_v38 }
0x3433   :  { %v3672_v39 = vpop.xlane.xlu1 %3671 }
0x3434   :  { %4798 = vrcp.f32 %v3672_v39 }
0x3435   :  { %v3675_v8 = vpop.xlane.xlu0 %3674 }
0x3436   :  { %4800 = vrcp.f32 %v3675_v8 }
0x3441   :  { %v4799_v45 = vpop.eup %4798 }
0x3442   :  { %v3678_v49 = vmul.f32 %v4799_v45, %v4795_v29 }
0x3443   :  { %v4801_v46 = vpop.eup %4800 }
0x3444   :  { %4647 = vmatmul.mubr.msk.f32.vlgmr.msra.gmra.mxu0 %vm591_vm8, %v3678_v49  ;;  %v3679_v58 = vmul.f32 %v4801_v46, %v4797_v37 }
0x3445   :  { %4655 = vmatpush3.msra.mxu0 %v5729_v28  ;;  %4670 = vmatprep.mubr.msk.f32.mxu0 %vm4903_vm0, %v4902_v0  ;;  %vm3946_vm0 = vcmask 779264  }
0x3446   :  { %4652 = vmatmul.mubr.msk.f32.vlgmr.msra.gmra.mxu1 %vm591_vm8, %v3679_v58  ;;  %4656 = vmatprep.subr.mxu0 %v4902_v0 }
0x3447   :  { %4657 = vmatpush3.msra.mxu0 %v5739_v30 }
0x3448   :  { %4658 = vmatprep.subr.mxu0 %v4902_v0 }
0x3449   :  { %4659 = vmatpush3.msra.mxu0 %v5748_v33 }
0x344a   :  { %4660 = vmatprep.subr.mxu0 %v4902_v0 }
0x344b   :  { %4661 = vmatpush3.msra.mxu0 %v5757_v25 }
0x344c   :  { %4662 = vmatprep.subr.mxu0 %v4902_v0 }
0x344d   :  { %4663 = vmatpush3.msra.mxu0 %v5766_v41 }
0x344e   :  { %4664 = vmatprep.subr.mxu0 %v4902_v0 }
0x344f   :  { %4665 = vmatpush3.msra.mxu0 %v5775_v47 }
0x3450   :  { %4666 = vmatprep.subr.mxu0 %v4902_v0 }
0x3451   :  { %4667 = vmatpush3.msra.mxu0 %v5784_v48 }
0x3452   :  { %4668 = vmatprep.subr.mxu0 %v4902_v0 }
0x3453   :  { %4669 = vmatpush3.msra.mxu0 %v5793_v50 }
0x3504   :  { %v3749_v28 = vpop.f32.mrf.mxu0 }
0x3506   :  { %v4648_v30 = vpop.f32.mrf.mxu0  ;;  %v3822_v33 = vpop.f32.mrf.mxu1 }
0x3507   :  { %v3829_v25 = vrot.slane %v3822_v33, 7 }
0x3508   :  { %v4653_v60 = vpop.f32.mrf.mxu1 }
0x3509   :  { %v3830_v62 = vsel %vm200_vm2, %v3829_v25, %v3749_v28 }
0x350a   :  { %3831 = vrot.lane.b32.xlu0 %v3830_v62, %s4906_s6 }
0x350e   :  { %3926 = vrot.lane.b32.xlu0 %v5483_v61, %s4906_s6 }
0x3512   :  { %3930 = vrot.lane.b32.xlu0 %v5671_v40, %s4909_s8 }
0x357c   :  { %v3832_v41 = vpop.permute.xlu0 %3831 }
0x357d   :  { %v3834_v0 = vsel %vm86_vm1, %v5853_v54, %v3832_v41 }
0x357e   :  { %4671 = vmatmul.mubr.msk.f32.vlgmr.msra.gmra.mxu0 %vm753_vm9, %v3834_v0 }
0x3580   :  { %v3927_v21 = vpop.permute.xlu0 %3926 }
0x3584   :  { %v3931_v26 = vpop.permute.xlu0 %3930 }
0x363e   :  { %v3904_v47 = vpop.f32.mrf.mxu0 }
0x363f   :  { %v3905_v48 = vadd.f32 %v5827_v36, %v3904_v47 }
0x3640   :  { %v4672_v50 = vpop.f32.mrf.mxu0 }
0x3641   :  { %v3908_v63 = vsel %vm827_vm10, %v3905_v48, -inf }
0x3642   :  { %3909 = vmax.xlane.f32.xlu1 %v3908_v63 }
0x36cb   :  { %v3910_v20 = vpop.xlane.xlu1 %3909 }
0x36cc   :  { %v3911_v4 = vsub.f32 %v3905_v48, %v3910_v20 }
0x36ce   :  { %v3912_v57 = vmul.f32 1.442695, %v3911_v4 }
0x36d0   :  { %4802 = vpow2.f32 %v3912_v57 }
0x36dd   :  { %v4803_v61 = vpop.eup %4802 }
0x36de   :  { %v3914_v40 = vsel %vm827_vm10, %v4803_v61, 0.0 }
0x36df   :  { %3915 = vadd.xlane.f32.xlu1 %v3914_v40 }
0x36f0   :  { %3922 = vrot.lane.b32.xlu1 %v5367_v3, %s4904_s0 }
0x36f4   :  { %3934 = vrot.lane.b32.xlu1 %v5832_v44, %s4905_s25 }
0x3768   :  { %v3916_v6 = vpop.xlane.xlu1 %3915 }
0x3769   :  { %4804 = vlog2.f32 %v3916_v6 }
0x376c   :  { %v3923_v51 = vpop.permute.xlu1 %3922 }
0x376d   :  { %v3941_v42 = vsel %vm205_vm4, %v5251_v31, %v3923_v51 }
0x376e   :  { %v3942_v24 = vsel %vm86_vm1, %v3941_v42, %v3927_v21 }
0x376f   :  { %v3943_v3 = vsel %vm207_vm5, %v3942_v24, %v3931_v26 }
0x3770   :  { %v3935_v19 = vpop.permute.xlu1 %3934 }
0x3771   :  { %v3944_v44 = vsel %vm753_vm9, %v3943_v3, %v3935_v19 }
0x3776   :  { %v4805_v36 = vpop.eup %4804 }
0x3777   :  { %v3918_v52 = vmul.f32 0.6931472, %v4805_v36 }
0x3779   :  { %v3919_v1 = vadd.f32 %v3918_v52, %v3910_v20 }
0x377b   :  { %v3920_v7 = vsub.f32 %v3905_v48, %v3919_v1 }
0x377d   :  { %3938 = vrot.lane.b32.xlu0 %v3920_v7, %s4908_s23 }
0x37ef   :  { %v3939_v27 = vpop.permute.xlu0 %3938 }
0x37f0   :  { %v3945_v53 = vsel %vm215_vm6, %v3944_v44, %v3939_v27 }
0x37f1   :  { %3947 = vst.msk [vmem:[%s5932_s9] sm:$0x3] %vm3946_vm0, %v3945_v53 }
0x37f2   :  { %3952 = vsyncpa [#allocation3], 1 }
0x37f3   :  { %3953 = vsyncpa [#allocation5], 1 }

</bundles_post_ra>
